<compile_context>
chip_gen: v5e
topology: v5e:2x2
jax: 0.10.0
libtpu: 0.0.40
codegen_flags: <defaults>
</compile_context>

<pallas_src>
import functools
import math

import jax
import jax.numpy as jnp
from jax.experimental import pallas as pl
from jax.experimental.pallas import tpu as pltpu

_VMEM_LIMIT = 64 * 1024 * 1024
# Default tile targets: multiples of 256 (fills v6e/v7x MXU) and of 128 (v5e MXU).
_TM, _TN, _TK = 256, 256, 512


def _round_up(x, m):
    return (x + m - 1) // m * m


# ----------------------------- Pallas kernels -------------------------------

def _matmul_bias_kernel(x_ref, w_ref, b_ref, o_ref, acc_ref, *, activation):
    # x: (tm, tk) bf16   w: (tk, tn) bf16   b: (1, tn) f32   acc: (tm, tn) f32
    k = pl.program_id(2)

    @pl.when(k == 0)
    def _init():
        acc_ref[...] = jnp.zeros_like(acc_ref)

    acc_ref[...] += jnp.dot(x_ref[...], w_ref[...], preferred_element_type=jnp.float32)

    @pl.when(k == pl.num_programs(2) - 1)
    def _finalize():
        y = acc_ref[...] + b_ref[...]
        if activation == "relu":
            y = jnp.maximum(y, 0.0)
        o_ref[...] = y.astype(o_ref.dtype)


def matmul_bias(x, w, b, activation=None, out_dtype=jnp.float32,
                tm=_TM, tn=_TN, tk=_TK):
    """y = x @ w + b (optional relu). Tiled over (M, N, K) with f32 accumulation."""
    M, K = x.shape
    N = w.shape[1]
    tm = M if M <= tm else tm          # full-dim blocks are exempt from (8,128) rule
    tn = N if N <= tn else tn
    tk = K if K <= tk else tk
    Mp, Np, Kp = _round_up(M, tm), _round_up(N, tn), _round_up(K, tk)

    xb = x.astype(jnp.bfloat16)
    wb = w.astype(jnp.bfloat16)
    bb = b.astype(jnp.float32).reshape(1, N)
    if (Mp, Kp) != (M, K):
        xb = jnp.pad(xb, ((0, Mp - M), (0, Kp - K)))
    if (Kp, Np) != (K, N):
        wb = jnp.pad(wb, ((0, Kp - K), (0, Np - N)))
    if Np != N:
        bb = jnp.pad(bb, ((0, 0), (0, Np - N)))

    out = pl.pallas_call(
        functools.partial(_matmul_bias_kernel, activation=activation),
        out_shape=jax.ShapeDtypeStruct((Mp, Np), out_dtype),
        grid_spec=pltpu.PrefetchScalarGridSpec(
            num_scalar_prefetch=0,
            grid=(Mp // tm, Np // tn, Kp // tk),
            in_specs=[
                pl.BlockSpec((tm, tk), lambda i, j, k: (i, k)),
                pl.BlockSpec((tk, tn), lambda i, j, k: (k, j)),
                pl.BlockSpec((1, tn), lambda i, j, k: (0, j)),
            ],
            out_specs=pl.BlockSpec((tm, tn), lambda i, j, k: (i, j)),
            scratch_shapes=[pltpu.VMEM((tm, tn), jnp.float32)],
        ),
        compiler_params=pltpu.CompilerParams(
            dimension_semantics=("parallel", "parallel", "arbitrary"),
            vmem_limit_bytes=_VMEM_LIMIT,
        ),
    )(xb, wb, bb)
    if (Mp, Np) != (M, N):
        out = out[:M, :N]
    return out


def _mm_bias_add_ln_kernel(x_ref, w_ref, b_ref, res_ref, g_ref, bt_ref,
                           o_ref, acc_ref, *, eps):
    # out = LayerNorm(res + x @ w + b) * gamma + beta   (N = d_model kept full-width)
    k = pl.program_id(1)

    @pl.when(k == 0)
    def _init():
        acc_ref[...] = jnp.zeros_like(acc_ref)

    acc_ref[...] += jnp.dot(x_ref[...], w_ref[...], preferred_element_type=jnp.float32)

    @pl.when(k == pl.num_programs(1) - 1)
    def _finalize():
        z = acc_ref[...] + b_ref[...] + res_ref[...].astype(jnp.float32)
        mu = jnp.mean(z, axis=-1, keepdims=True)
        var = jnp.mean((z - mu) * (z - mu), axis=-1, keepdims=True)
        zn = (z - mu) * jax.lax.rsqrt(var + eps)
        o_ref[...] = (zn * g_ref[...] + bt_ref[...]).astype(o_ref.dtype)


def matmul_bias_add_layernorm(x, w, b, res, gamma, beta, eps=1e-5,
                              tm=_TM, tk=_TK):
    """Fused: LayerNorm(res + x @ w + b).  N (= d_model) is a single full-width tile."""
    M, K = x.shape
    N = w.shape[1]
    tm = M if M <= tm else tm
    tk = K if K <= tk else tk
    Mp, Kp = _round_up(M, tm), _round_up(K, tk)

    xb = x.astype(jnp.bfloat16)
    wb = w.astype(jnp.bfloat16)
    if (Mp, Kp) != (M, K):
        xb = jnp.pad(xb, ((0, Mp - M), (0, Kp - K)))
    if Kp != K:
        wb = jnp.pad(wb, ((0, Kp - K), (0, 0)))
    resp = res if Mp == M else jnp.pad(res, ((0, Mp - M), (0, 0)))
    bb = b.astype(jnp.float32).reshape(1, N)
    gg = gamma.astype(jnp.float32).reshape(1, N)
    bt = beta.astype(jnp.float32).reshape(1, N)

    out = pl.pallas_call(
        functools.partial(_mm_bias_add_ln_kernel, eps=eps),
        out_shape=jax.ShapeDtypeStruct((Mp, N), jnp.float32),
        grid_spec=pltpu.PrefetchScalarGridSpec(
            num_scalar_prefetch=0,
            grid=(Mp // tm, Kp // tk),
            in_specs=[
                pl.BlockSpec((tm, tk), lambda i, k: (i, k)),   # x
                pl.BlockSpec((tk, N), lambda i, k: (k, 0)),    # w
                pl.BlockSpec((1, N), lambda i, k: (0, 0)),     # bias
                pl.BlockSpec((tm, N), lambda i, k: (i, 0)),    # residual
                pl.BlockSpec((1, N), lambda i, k: (0, 0)),     # gamma
                pl.BlockSpec((1, N), lambda i, k: (0, 0)),     # beta
            ],
            out_specs=pl.BlockSpec((tm, N), lambda i, k: (i, 0)),
            scratch_shapes=[pltpu.VMEM((tm, N), jnp.float32)],
        ),
        compiler_params=pltpu.CompilerParams(
            dimension_semantics=("parallel", "arbitrary"),
            vmem_limit_bytes=_VMEM_LIMIT,
        ),
    )(xb, wb, bb, resp, gg, bt)
    if Mp != M:
        out = out[:M]
    return out


def _attention_kernel(mask_ref, qkv_ref, o_ref, *, nhead, head_dim, d_model, scale):
    # qkv_ref: (1, S, 3*D) bf16 for one batch element; heads are sliced in-kernel
    # (no XLA-side split/transpose).  Softmax in f32; denominator via EUP reciprocal.
    mask = mask_ref[...]
    qkv = qkv_ref[0]                                   # (S, 3*D)
    outs = []
    for h in range(nhead):
        q = qkv[:, h * head_dim:(h + 1) * head_dim]
        k = qkv[:, d_model + h * head_dim: d_model + (h + 1) * head_dim]
        v = qkv[:, 2 * d_model + h * head_dim: 2 * d_model + (h + 1) * head_dim]
        s = jax.lax.dot_general(q, k, (((1,), (1,)), ((), ())),
                                preferred_element_type=jnp.float32)
        s = s * scale + mask
        s = s - jnp.max(s, axis=-1, keepdims=True)
        p = jnp.exp(s)
        p = p * pl.reciprocal(jnp.sum(p, axis=-1, keepdims=True), approx=True)
        outs.append(jnp.dot(p.astype(v.dtype), v, preferred_element_type=jnp.float32))
    # Single lane-dense store of all heads at once, already in (S, D) layout.
    o_ref[0] = jnp.concatenate(outs, axis=-1).astype(o_ref.dtype)


def mha_attention(qkv, src_mask, B, S, d_model, nhead):
    # qkv: (B*S, 3*D) bf16 -> attention output (B*S, D) bf16, no head transposes in XLA.
    # TODO(synk): for long sequences add a KV grid axis (flash-style online softmax) instead
    # of materializing the full (S, S) score matrix per head.
    head_dim = d_model // nhead
    scale = 1.0 / math.sqrt(head_dim)
    qkv3 = qkv.reshape(B, S, 3 * d_model)
    out = pl.pallas_call(
        functools.partial(_attention_kernel, nhead=nhead, head_dim=head_dim,
                          d_model=d_model, scale=scale),
        out_shape=jax.ShapeDtypeStruct((B, S, d_model), jnp.bfloat16),
        grid_spec=pltpu.PrefetchScalarGridSpec(
            num_scalar_prefetch=0,
            grid=(B,),
            in_specs=[
                pl.BlockSpec((S, S), lambda b: (0, 0)),
                pl.BlockSpec((1, S, 3 * d_model), lambda b: (b, 0, 0)),
            ],
            out_specs=pl.BlockSpec((1, S, d_model), lambda b: (b, 0, 0)),
        ),
        compiler_params=pltpu.CompilerParams(
            dimension_semantics=("parallel",),
            vmem_limit_bytes=_VMEM_LIMIT,
        ),
    )(src_mask, qkv3)
    return out.reshape(B * S, d_model)


def _scale_add_pe_kernel(x_ref, pe_ref, o_ref, *, scale):
    # x: (1, S, D), pe: (S, D) broadcast over batch inside the kernel (no pe_b in HBM)
    o_ref[0] = (x_ref[0] * scale + pe_ref[...]).astype(o_ref.dtype)


def scale_add_pe(emb, pe, scale):
    B, S, D = emb.shape
    return pl.pallas_call(
        functools.partial(_scale_add_pe_kernel, scale=scale),
        out_shape=jax.ShapeDtypeStruct((B, S, D), jnp.float32),
        grid_spec=pltpu.PrefetchScalarGridSpec(
            num_scalar_prefetch=0,
            grid=(B,),
            in_specs=[
                pl.BlockSpec((1, S, D), lambda b: (b, 0, 0)),
                pl.BlockSpec((S, D), lambda b: (0, 0)),
            ],
            out_specs=pl.BlockSpec((1, S, D), lambda b: (b, 0, 0)),
        ),
        compiler_params=pltpu.CompilerParams(dimension_semantics=("parallel",)),
    )(emb, pe)


# ------------------------------ model glue -----------------------------------

def positional_encoding_table(seq_len, d_model):
    position = jnp.arange(seq_len, dtype=jnp.float32)[:, None]
    div_term = jnp.exp(
        jnp.arange(0, d_model, 2, dtype=jnp.float32) * (-math.log(10000.0) / d_model)
    )
    pe = jnp.zeros((seq_len, d_model), dtype=jnp.float32)
    pe = pe.at[:, 0::2].set(jnp.sin(position * div_term))
    pe = pe.at[:, 1::2].set(jnp.cos(position * div_term))
    return pe  # (seq_len, d_model)


def init_params(key, vocab_size, d_model, nhead, num_layers, dim_feedforward):
    keys = jax.random.split(key, 2 + num_layers)
    bf16 = jnp.bfloat16
    params = {
        "embedding": jax.random.normal(keys[0], (vocab_size, d_model), jnp.float32),
        "fc_w": (jax.random.normal(keys[1], (d_model, vocab_size), jnp.float32) * 0.05).astype(bf16),
        "fc_b": jnp.zeros((vocab_size,), jnp.float32),
        "layers": [],
    }
    for l in range(num_layers):
        lk = jax.random.split(keys[2 + l], 4)
        params["layers"].append({
            "wqkv": (jax.random.normal(lk[0], (d_model, 3 * d_model), jnp.float32) * 0.05).astype(bf16),
            "bqkv": jnp.zeros((3 * d_model,), jnp.float32),
            "wo": (jax.random.normal(lk[1], (d_model, d_model), jnp.float32) * 0.05).astype(bf16),
            "bo": jnp.zeros((d_model,), jnp.float32),
            "ln1_g": jnp.ones((d_model,), jnp.float32),
            "ln1_b": jnp.zeros((d_model,), jnp.float32),
            "w1": (jax.random.normal(lk[2], (d_model, dim_feedforward), jnp.float32) * 0.05).astype(bf16),
            "b1": jnp.zeros((dim_feedforward,), jnp.float32),
            "w2": (jax.random.normal(lk[3], (dim_feedforward, d_model), jnp.float32) * 0.05).astype(bf16),
            "b2": jnp.zeros((d_model,), jnp.float32),
            "ln2_g": jnp.ones((d_model,), jnp.float32),
            "ln2_b": jnp.zeros((d_model,), jnp.float32),
        })
    return params


def encoder_layer_forward(x, layer, B, S, d_model, nhead, src_mask):
    # x: (B*S, D) f32 residual stream (post-norm PyTorch TransformerEncoderLayer).
    qkv = matmul_bias(x, layer["wqkv"], layer["bqkv"], out_dtype=jnp.bfloat16)   # (B*S, 3D)
    attn = mha_attention(qkv, src_mask, B, S, d_model, nhead)                    # (B*S, D)
    # fused: LayerNorm(x + attn @ Wo + bo)
    x = matmul_bias_add_layernorm(attn, layer["wo"], layer["bo"], x,
                                  layer["ln1_g"], layer["ln1_b"])
    # feed-forward: relu fused in w1 epilogue; residual+LN fused in w2 epilogue
    h = matmul_bias(x, layer["w1"], layer["b1"], activation="relu",
                    out_dtype=jnp.bfloat16)
    x = matmul_bias_add_layernorm(h, layer["w2"], layer["b2"], x,
                                  layer["ln2_g"], layer["ln2_b"])
    return x


def transformer_lm_forward(params, src, src_mask, *, d_model, nhead, num_layers):
    # src: (S, B) int32, src_mask: (S, S) additive mask. Internally batch-major (B, S, D)
    # so the head layout never needs an XLA transpose between kernels.
    S, B = src.shape
    emb = params["embedding"][src.T]                       # (B, S, D) gather (XLA glue)
    pe = positional_encoding_table(S, d_model)             # (S, D)
    x = scale_add_pe(emb, pe, math.sqrt(d_model))          # (B, S, D)
    # TODO(synk): dropout layers are identity here (eval-mode forward).
    x = x.reshape(B * S, d_model)

    for l in range(num_layers):
        x = encoder_layer_forward(x, params["layers"][l], B, S, d_model, nhead, src_mask)

    logits = matmul_bias(x, params["fc_w"], params["fc_b"])  # (B*S, V)
    return logits.reshape(B, S, -1).transpose(1, 0, 2)       # (S, B, V)


# --------------------------------- main ---------------------------------------

if __name__ == "__main__":
    vocab_size = 64
    d_model = 32
    nhead = 4
    num_layers = 2
    dim_feedforward = 64
    S, B = 8, 2

    key = jax.random.PRNGKey(0)
    pkey, skey = jax.random.split(key)

    params = init_params(pkey, vocab_size, d_model, nhead, num_layers, dim_feedforward)
    src = jax.random.randint(skey, (S, B), 0, vocab_size, dtype=jnp.int32)

    # causal additive mask, same convention as nn.Transformer.generate_square_subsequent_mask
    src_mask = jnp.where(
        jnp.arange(S)[None, :] <= jnp.arange(S)[:, None], 0.0, -1e9
    ).astype(jnp.float32)

    fwd = jax.jit(functools.partial(
        transformer_lm_forward, d_model=d_model, nhead=nhead, num_layers=num_layers))
    logits = fwd(params, src, src_mask)
    logits = jax.block_until_ready(logits)
    assert logits.shape == (S, B, vocab_size)
    assert bool(jnp.all(jnp.isfinite(logits)))
    print("KERNEL_OK")
</pallas_src>

<mosaic_0001>
module attributes {stable_mosaic.version = 11 : i64} {
  func.func @_scale_add_pe_kernel(%arg0: i32, %arg1: memref<1x8x32xf32, #tpu.memory_space<vmem>>, %arg2: memref<8x32xf32, #tpu.memory_space<vmem>>, %arg3: memref<1x8x32xf32, #tpu.memory_space<vmem>>) attributes {dimension_semantics = [#tpu.dimension_semantics<parallel>], iteration_bounds = array<i64: 2>, scalar_prefetch = 0 : i64, scratch_operands = 0 : i64, tpu.core_type = #tpu.core_type<tc>, window_params = [{transform_indices = @transform_0, window_bounds = array<i64: 1, 8, 32>}, {pipeline_mode = #tpu.pipeline_mode<synchronous>, transform_indices = @transform_1, window_bounds = array<i64: 8, 32>}, {transform_indices = @transform_2, window_bounds = array<i64: 1, 8, 32>}]} {
    %c0 = arith.constant 0 : index
    %c0_0 = arith.constant 0 : index
    %c0_1 = arith.constant 0 : index
    %0 = vector.load %arg1[%c0, %c0_0, %c0_1] : memref<1x8x32xf32, #tpu.memory_space<vmem>>, vector<1x8x32xf32>
    %1 = vector.shape_cast %0 : vector<1x8x32xf32> to vector<8x32xf32>
    %cst = arith.constant 5.65685415 : f32
    %2 = vector.broadcast %cst : f32 to vector<8x32xf32>
    %3 = arith.mulf %1, %2 : vector<8x32xf32>
    %c0_2 = arith.constant 0 : index
    %c0_3 = arith.constant 0 : index
    %4 = vector.load %arg2[%c0_2, %c0_3] : memref<8x32xf32, #tpu.memory_space<vmem>>, vector<8x32xf32>
    %5 = arith.addf %3, %4 : vector<8x32xf32>
    %c0_4 = arith.constant 0 : index
    %c0_5 = arith.constant 0 : index
    %c0_6 = arith.constant 0 : index
    %6 = vector.load %arg3[%c0_4, %c0_5, %c0_6] : memref<1x8x32xf32, #tpu.memory_space<vmem>>, vector<1x8x32xf32>
    %7 = vector.shape_cast %6 : vector<1x8x32xf32> to vector<8x32xf32>
    %8 = vector.shape_cast %5 : vector<8x32xf32> to vector<1x8x32xf32>
    tpu.vector_store %arg3[%c0_4, %c0_5, %c0_6], %8 {strides = array<i32>} : memref<1x8x32xf32, #tpu.memory_space<vmem>>, vector<1x8x32xf32>,
    return
  }
  func.func @transform_0(%arg0: i32) -> (i32, i32, i32) {
    %c0_i32 = arith.constant 0 : i32
    %c0_i32_0 = arith.constant 0 : i32
    %c0_i32_1 = arith.constant 0 : i32
    return %arg0, %c0_i32, %c0_i32_0 : i32, i32, i32
  }
  func.func @transform_1(%arg0: i32) -> (i32, i32) {
    %c0_i32 = arith.constant 0 : i32
    %c0_i32_0 = arith.constant 0 : i32
    %c0_i32_1 = arith.constant 0 : i32
    return %c0_i32, %c0_i32_0 : i32, i32
  }
  func.func @transform_2(%arg0: i32) -> (i32, i32, i32) {
    %c0_i32 = arith.constant 0 : i32
    %c0_i32_0 = arith.constant 0 : i32
    %c0_i32_1 = arith.constant 0 : i32
    return %arg0, %c0_i32, %c0_i32_0 : i32, i32, i32
  }
}

module attributes {stable_mosaic.version = 11 : i64} {
  func.func @_matmul_bias_kernel(%arg0: i32, %arg1: i32, %arg2: i32, %arg3: memref<16x32xbf16, #tpu.memory_space<vmem>>, %arg4: memref<32x96xbf16, #tpu.memory_space<vmem>>, %arg5: memref<1x96xf32, #tpu.memory_space<vmem>>, %arg6: memref<16x96xbf16, #tpu.memory_space<vmem>>, %arg7: memref<16x96xf32, #tpu.memory_space<vmem>>) attributes {dimension_semantics = [#tpu.dimension_semantics<parallel>, #tpu.dimension_semantics<parallel>, #tpu.dimension_semantics<arbitrary>], iteration_bounds = array<i64: 1, 1, 1>, scalar_prefetch = 0 : i64, scratch_operands = 1 : i64, tpu.core_type = #tpu.core_type<tc>, window_params = [{transform_indices = @transform_0, window_bounds = array<i64: 16, 32>}, {transform_indices = @transform_1, window_bounds = array<i64: 32, 96>}, {transform_indices = @transform_2, window_bounds = array<i64: 1, 96>}, {transform_indices = @transform_3, window_bounds = array<i64: 16, 96>}]} {
    %c0_i32 = arith.constant 0 : i32
    %0 = arith.cmpi eq, %arg2, %c0_i32 : i32
    %1 = arith.extui %0 : i1 to i32
    %c0_i32_0 = arith.constant 0 : i32
    %2 = arith.cmpi ne, %1, %c0_i32_0 : i32
    scf.if %2 {
      %cst_10 = arith.constant 0.000000e+00 : f32
      %12 = vector.broadcast %cst_10 : f32 to vector<16x96xf32>
      %c0_11 = arith.constant 0 : index
      %c0_12 = arith.constant 0 : index
      %13 = vector.load %arg7[%c0_11, %c0_12] : memref<16x96xf32, #tpu.memory_space<vmem>>, vector<16x96xf32>
      tpu.vector_store %arg7[%c0_11, %c0_12], %12 {strides = array<i32>} : memref<16x96xf32, #tpu.memory_space<vmem>>, vector<16x96xf32>,
    } else {
    }
    %c0 = arith.constant 0 : index
    %c0_1 = arith.constant 0 : index
    %3 = vector.load %arg7[%c0, %c0_1] : memref<16x96xf32, #tpu.memory_space<vmem>>, vector<16x96xf32>
    %c0_2 = arith.constant 0 : index
    %c0_3 = arith.constant 0 : index
    %4 = vector.load %arg3[%c0_2, %c0_3] : memref<16x32xbf16, #tpu.memory_space<vmem>>, vector<16x32xbf16>
    %c0_4 = arith.constant 0 : index
    %c0_5 = arith.constant 0 : index
    %5 = vector.load %arg4[%c0_4, %c0_5] : memref<32x96xbf16, #tpu.memory_space<vmem>>, vector<32x96xbf16>
    %cst = arith.constant dense<0.000000e+00> : vector<16x96xf32>
    %6 = tpu.matmul %4, %5, %cst {dimension_numbers = #tpu.dot_dimension_numbers<[1], [0], [0], [1], [0, 0, 1, 1], [], []>} : vector<16x32xbf16>, vector<32x96xbf16>, vector<16x96xf32> -> vector<16x96xf32>
    %7 = arith.addf %3, %6 : vector<16x96xf32>
    %c0_6 = arith.constant 0 : index
    %c0_7 = arith.constant 0 : index
    %8 = vector.load %arg7[%c0_6, %c0_7] : memref<16x96xf32, #tpu.memory_space<vmem>>, vector<16x96xf32>
    tpu.vector_store %arg7[%c0_6, %c0_7], %7 {strides = array<i32>} : memref<16x96xf32, #tpu.memory_space<vmem>>, vector<16x96xf32>,
    %c0_i32_8 = arith.constant 0 : i32
    %9 = arith.cmpi eq, %arg2, %c0_i32_8 : i32
    %10 = arith.extui %9 : i1 to i32
    %c0_i32_9 = arith.constant 0 : i32
    %11 = arith.cmpi ne, %10, %c0_i32_9 : i32
    scf.if %11 {
      %c0_10 = arith.constant 0 : index
      %c0_11 = arith.constant 0 : index
      %12 = vector.load %arg7[%c0_10, %c0_11] : memref<16x96xf32, #tpu.memory_space<vmem>>, vector<16x96xf32>
      %c0_12 = arith.constant 0 : index
      %c0_13 = arith.constant 0 : index
      %13 = vector.load %arg5[%c0_12, %c0_13] : memref<1x96xf32, #tpu.memory_space<vmem>>, vector<1x96xf32>
      %14 = vector.broadcast %13 : vector<1x96xf32> to vector<16x96xf32>
      %15 = arith.addf %12, %14 : vector<16x96xf32>
      %16 = arith.truncf %15 : vector<16x96xf32> to vector<16x96xbf16>
      %c0_14 = arith.constant 0 : index
      %c0_15 = arith.constant 0 : index
      %17 = vector.load %arg6[%c0_14, %c0_15] : memref<16x96xbf16, #tpu.memory_space<vmem>>, vector<16x96xbf16>
      tpu.vector_store %arg6[%c0_14, %c0_15], %16 {strides = array<i32>} : memref<16x96xbf16, #tpu.memory_space<vmem>>, vector<16x96xbf16>,
    } else {
    }
    return
  }
  func.func @transform_0(%arg0: i32, %arg1: i32, %arg2: i32) -> (i32, i32) {
    %c0_i32 = arith.constant 0 : i32
    return %arg0, %arg2 : i32, i32
  }
  func.func @transform_1(%arg0: i32, %arg1: i32, %arg2: i32) -> (i32, i32) {
    %c0_i32 = arith.constant 0 : i32
    return %arg2, %arg1 : i32, i32
  }
  func.func @transform_2(%arg0: i32, %arg1: i32, %arg2: i32) -> (i32, i32) {
    %c0_i32 = arith.constant 0 : i32
    %c0_i32_0 = arith.constant 0 : i32
    return %c0_i32, %arg1 : i32, i32
  }
  func.func @transform_3(%arg0: i32, %arg1: i32, %arg2: i32) -> (i32, i32) {
    %c0_i32 = arith.constant 0 : i32
    return %arg0, %arg1 : i32, i32
  }
}

module attributes {stable_mosaic.version = 11 : i64} {
  func.func @_attention_kernel(%arg0: i32, %arg1: memref<8x8xf32, #tpu.memory_space<vmem>>, %arg2: memref<1x8x96xbf16, #tpu.memory_space<vmem>>, %arg3: memref<1x8x32xbf16, #tpu.memory_space<vmem>>) attributes {dimension_semantics = [#tpu.dimension_semantics<parallel>], iteration_bounds = array<i64: 2>, scalar_prefetch = 0 : i64, scratch_operands = 0 : i64, tpu.core_type = #tpu.core_type<tc>, window_params = [{pipeline_mode = #tpu.pipeline_mode<synchronous>, transform_indices = @transform_0, window_bounds = array<i64: 8, 8>}, {transform_indices = @transform_1, window_bounds = array<i64: 1, 8, 96>}, {transform_indices = @transform_2, window_bounds = array<i64: 1, 8, 32>}]} {
    %c0 = arith.constant 0 : index
    %c0_0 = arith.constant 0 : index
    %0 = vector.load %arg1[%c0, %c0_0] : memref<8x8xf32, #tpu.memory_space<vmem>>, vector<8x8xf32>
    %c0_1 = arith.constant 0 : index
    %c0_2 = arith.constant 0 : index
    %c0_3 = arith.constant 0 : index
    %1 = vector.load %arg2[%c0_1, %c0_2, %c0_3] : memref<1x8x96xbf16, #tpu.memory_space<vmem>>, vector<1x8x96xbf16>
    %2 = vector.shape_cast %1 : vector<1x8x96xbf16> to vector<8x96xbf16>
    %3 = vector.extract_strided_slice %2 {offsets = [0, 0], sizes = [8, 8], strides = [1, 1]} : vector<8x96xbf16> to vector<8x8xbf16>
    %4 = vector.extract_strided_slice %2 {offsets = [0, 32], sizes = [8, 8], strides = [1, 1]} : vector<8x96xbf16> to vector<8x8xbf16>
    %5 = vector.extract_strided_slice %2 {offsets = [0, 64], sizes = [8, 8], strides = [1, 1]} : vector<8x96xbf16> to vector<8x8xbf16>
    %cst = arith.constant dense<0.000000e+00> : vector<8x8xf32>
    %6 = tpu.matmul %3, %4, %cst {dimension_numbers = #tpu.dot_dimension_numbers<[1], [1], [0], [0], [0, 0, 1, 0], [], []>} : vector<8x8xbf16>, vector<8x8xbf16>, vector<8x8xf32> -> vector<8x8xf32>
    %cst_4 = arith.constant 0.353553385 : f32
    %7 = vector.broadcast %cst_4 : f32 to vector<8x8xf32>
    %8 = arith.mulf %6, %7 : vector<8x8xf32>
    %9 = arith.addf %8, %0 : vector<8x8xf32>
    %cst_5 = arith.constant dense<0xFF800000> : vector<8xf32>
    %10 = vector.multi_reduction <maximumf>, %9, %cst_5 [1] : vector<8x8xf32> to vector<8xf32>
    %11 = vector.shape_cast %10 : vector<8xf32> to vector<8x1xf32>
    %12 = vector.broadcast %11 : vector<8x1xf32> to vector<8x8xf32>
    %13 = arith.subf %9, %12 : vector<8x8xf32>
    %14 = math.exp %13 : vector<8x8xf32>
    %cst_6 = arith.constant dense<0.000000e+00> : vector<8xf32>
    %15 = vector.multi_reduction <add>, %14, %cst_6 [1] : vector<8x8xf32> to vector<8xf32>
    %16 = vector.shape_cast %15 : vector<8xf32> to vector<8x1xf32>
    %17 = tpu.reciprocal %16 {approx = true} : vector<8x1xf32> -> vector<8x1xf32>
    %18 = vector.broadcast %17 : vector<8x1xf32> to vector<8x8xf32>
    %19 = arith.mulf %14, %18 : vector<8x8xf32>
    %20 = arith.truncf %19 : vector<8x8xf32> to vector<8x8xbf16>
    %cst_7 = arith.constant dense<0.000000e+00> : vector<8x8xf32>
    %21 = tpu.matmul %20, %5, %cst_7 {dimension_numbers = #tpu.dot_dimension_numbers<[1], [0], [0], [1], [0, 0, 1, 1], [], []>} : vector<8x8xbf16>, vector<8x8xbf16>, vector<8x8xf32> -> vector<8x8xf32>
    %22 = vector.extract_strided_slice %2 {offsets = [0, 8], sizes = [8, 8], strides = [1, 1]} : vector<8x96xbf16> to vector<8x8xbf16>
    %23 = vector.extract_strided_slice %2 {offsets = [0, 40], sizes = [8, 8], strides = [1, 1]} : vector<8x96xbf16> to vector<8x8xbf16>
    %24 = vector.extract_strided_slice %2 {offsets = [0, 72], sizes = [8, 8], strides = [1, 1]} : vector<8x96xbf16> to vector<8x8xbf16>
    %cst_8 = arith.constant dense<0.000000e+00> : vector<8x8xf32>
    %25 = tpu.matmul %22, %23, %cst_8 {dimension_numbers = #tpu.dot_dimension_numbers<[1], [1], [0], [0], [0, 0, 1, 0], [], []>} : vector<8x8xbf16>, vector<8x8xbf16>, vector<8x8xf32> -> vector<8x8xf32>
    %cst_9 = arith.constant 0.353553385 : f32
    %26 = vector.broadcast %cst_9 : f32 to vector<8x8xf32>
    %27 = arith.mulf %25, %26 : vector<8x8xf32>
    %28 = arith.addf %27, %0 : vector<8x8xf32>
    %cst_10 = arith.constant dense<0xFF800000> : vector<8xf32>
    %29 = vector.multi_reduction <maximumf>, %28, %cst_10 [1] : vector<8x8xf32> to vector<8xf32>
    %30 = vector.shape_cast %29 : vector<8xf32> to vector<8x1xf32>
    %31 = vector.broadcast %30 : vector<8x1xf32> to vector<8x8xf32>
    %32 = arith.subf %28, %31 : vector<8x8xf32>
    %33 = math.exp %32 : vector<8x8xf32>
    %cst_11 = arith.constant dense<0.000000e+00> : vector<8xf32>
    %34 = vector.multi_reduction <add>, %33, %cst_11 [1] : vector<8x8xf32> to vector<8xf32>
    %35 = vector.shape_cast %34 : vector<8xf32> to vector<8x1xf32>
    %36 = tpu.reciprocal %35 {approx = true} : vector<8x1xf32> -> vector<8x1xf32>
    %37 = vector.broadcast %36 : vector<8x1xf32> to vector<8x8xf32>
    %38 = arith.mulf %33, %37 : vector<8x8xf32>
    %39 = arith.truncf %38 : vector<8x8xf32> to vector<8x8xbf16>
    %cst_12 = arith.constant dense<0.000000e+00> : vector<8x8xf32>
    %40 = tpu.matmul %39, %24, %cst_12 {dimension_numbers = #tpu.dot_dimension_numbers<[1], [0], [0], [1], [0, 0, 1, 1], [], []>} : vector<8x8xbf16>, vector<8x8xbf16>, vector<8x8xf32> -> vector<8x8xf32>
    %41 = vector.extract_strided_slice %2 {offsets = [0, 16], sizes = [8, 8], strides = [1, 1]} : vector<8x96xbf16> to vector<8x8xbf16>
    %42 = vector.extract_strided_slice %2 {offsets = [0, 48], sizes = [8, 8], strides = [1, 1]} : vector<8x96xbf16> to vector<8x8xbf16>
    %43 = vector.extract_strided_slice %2 {offsets = [0, 80], sizes = [8, 8], strides = [1, 1]} : vector<8x96xbf16> to vector<8x8xbf16>
    %cst_13 = arith.constant dense<0.000000e+00> : vector<8x8xf32>
    %44 = tpu.matmul %41, %42, %cst_13 {dimension_numbers = #tpu.dot_dimension_numbers<[1], [1], [0], [0], [0, 0, 1, 0], [], []>} : vector<8x8xbf16>, vector<8x8xbf16>, vector<8x8xf32> -> vector<8x8xf32>
    %cst_14 = arith.constant 0.353553385 : f32
    %45 = vector.broadcast %cst_14 : f32 to vector<8x8xf32>
    %46 = arith.mulf %44, %45 : vector<8x8xf32>
    %47 = arith.addf %46, %0 : vector<8x8xf32>
    %cst_15 = arith.constant dense<0xFF800000> : vector<8xf32>
    %48 = vector.multi_reduction <maximumf>, %47, %cst_15 [1] : vector<8x8xf32> to vector<8xf32>
    %49 = vector.shape_cast %48 : vector<8xf32> to vector<8x1xf32>
    %50 = vector.broadcast %49 : vector<8x1xf32> to vector<8x8xf32>
    %51 = arith.subf %47, %50 : vector<8x8xf32>
    %52 = math.exp %51 : vector<8x8xf32>
    %cst_16 = arith.constant dense<0.000000e+00> : vector<8xf32>
    %53 = vector.multi_reduction <add>, %52, %cst_16 [1] : vector<8x8xf32> to vector<8xf32>
    %54 = vector.shape_cast %53 : vector<8xf32> to vector<8x1xf32>
    %55 = tpu.reciprocal %54 {approx = true} : vector<8x1xf32> -> vector<8x1xf32>
    %56 = vector.broadcast %55 : vector<8x1xf32> to vector<8x8xf32>
    %57 = arith.mulf %52, %56 : vector<8x8xf32>
    %58 = arith.truncf %57 : vector<8x8xf32> to vector<8x8xbf16>
    %cst_17 = arith.constant dense<0.000000e+00> : vector<8x8xf32>
    %59 = tpu.matmul %58, %43, %cst_17 {dimension_numbers = #tpu.dot_dimension_numbers<[1], [0], [0], [1], [0, 0, 1, 1], [], []>} : vector<8x8xbf16>, vector<8x8xbf16>, vector<8x8xf32> -> vector<8x8xf32>
    %60 = vector.extract_strided_slice %2 {offsets = [0, 24], sizes = [8, 8], strides = [1, 1]} : vector<8x96xbf16> to vector<8x8xbf16>
    %61 = vector.extract_strided_slice %2 {offsets = [0, 56], sizes = [8, 8], strides = [1, 1]} : vector<8x96xbf16> to vector<8x8xbf16>
    %62 = vector.extract_strided_slice %2 {offsets = [0, 88], sizes = [8, 8], strides = [1, 1]} : vector<8x96xbf16> to vector<8x8xbf16>
    %cst_18 = arith.constant dense<0.000000e+00> : vector<8x8xf32>
    %63 = tpu.matmul %60, %61, %cst_18 {dimension_numbers = #tpu.dot_dimension_numbers<[1], [1], [0], [0], [0, 0, 1, 0], [], []>} : vector<8x8xbf16>, vector<8x8xbf16>, vector<8x8xf32> -> vector<8x8xf32>
    %cst_19 = arith.constant 0.353553385 : f32
    %64 = vector.broadcast %cst_19 : f32 to vector<8x8xf32>
    %65 = arith.mulf %63, %64 : vector<8x8xf32>
    %66 = arith.addf %65, %0 : vector<8x8xf32>
    %cst_20 = arith.constant dense<0xFF800000> : vector<8xf32>
    %67 = vector.multi_reduction <maximumf>, %66, %cst_20 [1] : vector<8x8xf32> to vector<8xf32>
    %68 = vector.shape_cast %67 : vector<8xf32> to vector<8x1xf32>
    %69 = vector.broadcast %68 : vector<8x1xf32> to vector<8x8xf32>
    %70 = arith.subf %66, %69 : vector<8x8xf32>
    %71 = math.exp %70 : vector<8x8xf32>
    %cst_21 = arith.constant dense<0.000000e+00> : vector<8xf32>
    %72 = vector.multi_reduction <add>, %71, %cst_21 [1] : vector<8x8xf32> to vector<8xf32>
    %73 = vector.shape_cast %72 : vector<8xf32> to vector<8x1xf32>
    %74 = tpu.reciprocal %73 {approx = true} : vector<8x1xf32> -> vector<8x1xf32>
    %75 = vector.broadcast %74 : vector<8x1xf32> to vector<8x8xf32>
    %76 = arith.mulf %71, %75 : vector<8x8xf32>
    %77 = arith.truncf %76 : vector<8x8xf32> to vector<8x8xbf16>
    %cst_22 = arith.constant dense<0.000000e+00> : vector<8x8xf32>
    %78 = tpu.matmul %77, %62, %cst_22 {dimension_numbers = #tpu.dot_dimension_numbers<[1], [0], [0], [1], [0, 0, 1, 1], [], []>} : vector<8x8xbf16>, vector<8x8xbf16>, vector<8x8xf32> -> vector<8x8xf32>
    %79 = tpu.concatenate %21, %40, %59, %78 in 1 : vector<8x8xf32>, vector<8x8xf32>, vector<8x8xf32>, vector<8x8xf32> -> vector<8x32xf32>
    %80 = arith.truncf %79 : vector<8x32xf32> to vector<8x32xbf16>
    %c0_23 = arith.constant 0 : index
    %c0_24 = arith.constant 0 : index
    %c0_25 = arith.constant 0 : index
    %81 = vector.load %arg3[%c0_23, %c0_24, %c0_25] : memref<1x8x32xbf16, #tpu.memory_space<vmem>>, vector<1x8x32xbf16>
    %82 = vector.shape_cast %81 : vector<1x8x32xbf16> to vector<8x32xbf16>
    %83 = vector.shape_cast %80 : vector<8x32xbf16> to vector<1x8x32xbf16>
    tpu.vector_store %arg3[%c0_23, %c0_24, %c0_25], %83 {strides = array<i32>} : memref<1x8x32xbf16, #tpu.memory_space<vmem>>, vector<1x8x32xbf16>,
    return
  }
  func.func @transform_0(%arg0: i32) -> (i32, i32) {
    %c0_i32 = arith.constant 0 : i32
    %c0_i32_0 = arith.constant 0 : i32
    %c0_i32_1 = arith.constant 0 : i32
    return %c0_i32, %c0_i32_0 : i32, i32
  }
  func.func @transform_1(%arg0: i32) -> (i32, i32, i32) {
    %c0_i32 = arith.constant 0 : i32
    %c0_i32_0 = arith.constant 0 : i32
    %c0_i32_1 = arith.constant 0 : i32
    return %arg0, %c0_i32, %c0_i32_0 : i32, i32, i32
  }
  func.func @transform_2(%arg0: i32) -> (i32, i32, i32) {
    %c0_i32 = arith.constant 0 : i32
    %c0_i32_0 = arith.constant 0 : i32
    %c0_i32_1 = arith.constant 0 : i32
    return %arg0, %c0_i32, %c0_i32_0 : i32, i32, i32
  }
}

module attributes {stable_mosaic.version = 11 : i64} {
  func.func @_mm_bias_add_ln_kernel(%arg0: i32, %arg1: i32, %arg2: memref<16x32xbf16, #tpu.memory_space<vmem>>, %arg3: memref<32x32xbf16, #tpu.memory_space<vmem>>, %arg4: memref<1x32xf32, #tpu.memory_space<vmem>>, %arg5: memref<16x32xf32, #tpu.memory_space<vmem>>, %arg6: memref<1x32xf32, #tpu.memory_space<vmem>>, %arg7: memref<1x32xf32, #tpu.memory_space<vmem>>, %arg8: memref<16x32xf32, #tpu.memory_space<vmem>>, %arg9: memref<16x32xf32, #tpu.memory_space<vmem>>) attributes {dimension_semantics = [#tpu.dimension_semantics<parallel>, #tpu.dimension_semantics<arbitrary>], iteration_bounds = array<i64: 1, 1>, scalar_prefetch = 0 : i64, scratch_operands = 1 : i64, tpu.core_type = #tpu.core_type<tc>, window_params = [{transform_indices = @transform_0, window_bounds = array<i64: 16, 32>}, {transform_indices = @transform_1, window_bounds = array<i64: 32, 32>}, {pipeline_mode = #tpu.pipeline_mode<synchronous>, transform_indices = @transform_2, window_bounds = array<i64: 1, 32>}, {transform_indices = @transform_3, window_bounds = array<i64: 16, 32>}, {pipeline_mode = #tpu.pipeline_mode<synchronous>, transform_indices = @transform_4, window_bounds = array<i64: 1, 32>}, {pipeline_mode = #tpu.pipeline_mode<synchronous>, transform_indices = @transform_5, window_bounds = array<i64: 1, 32>}, {transform_indices = @transform_6, window_bounds = array<i64: 16, 32>}]} {
    %c0_i32 = arith.constant 0 : i32
    %0 = arith.cmpi eq, %arg1, %c0_i32 : i32
    %1 = arith.extui %0 : i1 to i32
    %c0_i32_0 = arith.constant 0 : i32
    %2 = arith.cmpi ne, %1, %c0_i32_0 : i32
    scf.if %2 {
      %cst_10 = arith.constant 0.000000e+00 : f32
      %12 = vector.broadcast %cst_10 : f32 to vector<16x32xf32>
      %c0_11 = arith.constant 0 : index
      %c0_12 = arith.constant 0 : index
      %13 = vector.load %arg9[%c0_11, %c0_12] : memref<16x32xf32, #tpu.memory_space<vmem>>, vector<16x32xf32>
      tpu.vector_store %arg9[%c0_11, %c0_12], %12 {strides = array<i32>} : memref<16x32xf32, #tpu.memory_space<vmem>>, vector<16x32xf32>,
    } else {
    }
    %c0 = arith.constant 0 : index
    %c0_1 = arith.constant 0 : index
    %3 = vector.load %arg9[%c0, %c0_1] : memref<16x32xf32, #tpu.memory_space<vmem>>, vector<16x32xf32>
    %c0_2 = arith.constant 0 : index
    %c0_3 = arith.constant 0 : index
    %4 = vector.load %arg2[%c0_2, %c0_3] : memref<16x32xbf16, #tpu.memory_space<vmem>>, vector<16x32xbf16>
    %c0_4 = arith.constant 0 : index
    %c0_5 = arith.constant 0 : index
    %5 = vector.load %arg3[%c0_4, %c0_5] : memref<32x32xbf16, #tpu.memory_space<vmem>>, vector<32x32xbf16>
    %cst = arith.constant dense<0.000000e+00> : vector<16x32xf32>
    %6 = tpu.matmul %4, %5, %cst {dimension_numbers = #tpu.dot_dimension_numbers<[1], [0], [0], [1], [0, 0, 1, 1], [], []>} : vector<16x32xbf16>, vector<32x32xbf16>, vector<16x32xf32> -> vector<16x32xf32>
    %7 = arith.addf %3, %6 : vector<16x32xf32>
    %c0_6 = arith.constant 0 : index
    %c0_7 = arith.constant 0 : index
    %8 = vector.load %arg9[%c0_6, %c0_7] : memref<16x32xf32, #tpu.memory_space<vmem>>, vector<16x32xf32>
    tpu.vector_store %arg9[%c0_6, %c0_7], %7 {strides = array<i32>} : memref<16x32xf32, #tpu.memory_space<vmem>>, vector<16x32xf32>,
    %c0_i32_8 = arith.constant 0 : i32
    %9 = arith.cmpi eq, %arg1, %c0_i32_8 : i32
    %10 = arith.extui %9 : i1 to i32
    %c0_i32_9 = arith.constant 0 : i32
    %11 = arith.cmpi ne, %10, %c0_i32_9 : i32
    scf.if %11 {
      %c0_10 = arith.constant 0 : index
      %c0_11 = arith.constant 0 : index
      %12 = vector.load %arg9[%c0_10, %c0_11] : memref<16x32xf32, #tpu.memory_space<vmem>>, vector<16x32xf32>
      %c0_12 = arith.constant 0 : index
      %c0_13 = arith.constant 0 : index
      %13 = vector.load %arg4[%c0_12, %c0_13] : memref<1x32xf32, #tpu.memory_space<vmem>>, vector<1x32xf32>
      %14 = vector.broadcast %13 : vector<1x32xf32> to vector<16x32xf32>
      %15 = arith.addf %12, %14 : vector<16x32xf32>
      %c0_14 = arith.constant 0 : index
      %c0_15 = arith.constant 0 : index
      %16 = vector.load %arg5[%c0_14, %c0_15] : memref<16x32xf32, #tpu.memory_space<vmem>>, vector<16x32xf32>
      %17 = arith.addf %15, %16 : vector<16x32xf32>
      %cst_16 = arith.constant dense<0.000000e+00> : vector<16xf32>
      %18 = vector.multi_reduction <add>, %17, %cst_16 [1] : vector<16x32xf32> to vector<16xf32>
      %19 = vector.shape_cast %18 : vector<16xf32> to vector<16x1xf32>
      %cst_17 = arith.constant 3.200000e+01 : f32
      %20 = vector.broadcast %cst_17 : f32 to vector<16x1xf32>
      %21 = arith.divf %19, %20 : vector<16x1xf32>
      %22 = vector.broadcast %21 : vector<16x1xf32> to vector<16x32xf32>
      %23 = arith.subf %17, %22 : vector<16x32xf32>
      %24 = vector.broadcast %21 : vector<16x1xf32> to vector<16x32xf32>
      %25 = arith.subf %17, %24 : vector<16x32xf32>
      %26 = arith.mulf %23, %25 : vector<16x32xf32>
      %cst_18 = arith.constant dense<0.000000e+00> : vector<16xf32>
      %27 = vector.multi_reduction <add>, %26, %cst_18 [1] : vector<16x32xf32> to vector<16xf32>
      %28 = vector.shape_cast %27 : vector<16xf32> to vector<16x1xf32>
      %cst_19 = arith.constant 3.200000e+01 : f32
      %29 = vector.broadcast %cst_19 : f32 to vector<16x1xf32>
      %30 = arith.divf %28, %29 : vector<16x1xf32>
      %31 = vector.broadcast %21 : vector<16x1xf32> to vector<16x32xf32>
      %32 = arith.subf %17, %31 : vector<16x32xf32>
      %cst_20 = arith.constant 9.99999974E-6 : f32
      %33 = vector.broadcast %cst_20 : f32 to vector<16x1xf32>
      %34 = arith.addf %30, %33 : vector<16x1xf32>
      %35 = math.rsqrt %34 : vector<16x1xf32>
      %36 = vector.broadcast %35 : vector<16x1xf32> to vector<16x32xf32>
      %37 = arith.mulf %32, %36 : vector<16x32xf32>
      %c0_21 = arith.constant 0 : index
      %c0_22 = arith.constant 0 : index
      %38 = vector.load %arg6[%c0_21, %c0_22] : memref<1x32xf32, #tpu.memory_space<vmem>>, vector<1x32xf32>
      %39 = vector.broadcast %38 : vector<1x32xf32> to vector<16x32xf32>
      %40 = arith.mulf %37, %39 : vector<16x32xf32>
      %c0_23 = arith.constant 0 : index
      %c0_24 = arith.constant 0 : index
      %41 = vector.load %arg7[%c0_23, %c0_24] : memref<1x32xf32, #tpu.memory_space<vmem>>, vector<1x32xf32>
      %42 = vector.broadcast %41 : vector<1x32xf32> to vector<16x32xf32>
      %43 = arith.addf %40, %42 : vector<16x32xf32>
      %c0_25 = arith.constant 0 : index
      %c0_26 = arith.constant 0 : index
      %44 = vector.load %arg8[%c0_25, %c0_26] : memref<16x32xf32, #tpu.memory_space<vmem>>, vector<16x32xf32>
      tpu.vector_store %arg8[%c0_25, %c0_26], %43 {strides = array<i32>} : memref<16x32xf32, #tpu.memory_space<vmem>>, vector<16x32xf32>,
    } else {
    }
    return
  }
  func.func @transform_0(%arg0: i32, %arg1: i32) -> (i32, i32) {
    %c0_i32 = arith.constant 0 : i32
    return %arg0, %arg1 : i32, i32
  }
  func.func @transform_1(%arg0: i32, %arg1: i32) -> (i32, i32) {
    %c0_i32 = arith.constant 0 : i32
    %c0_i32_0 = arith.constant 0 : i32
    return %arg1, %c0_i32 : i32, i32
  }
  func.func @transform_2(%arg0: i32, %arg1: i32) -> (i32, i32) {
    %c0_i32 = arith.constant 0 : i32
    %c0_i32_0 = arith.constant 0 : i32
    %c0_i32_1 = arith.constant 0 : i32
    return %c0_i32, %c0_i32_0 : i32, i32
  }
  func.func @transform_3(%arg0: i32, %arg1: i32) -> (i32, i32) {
    %c0_i32 = arith.constant 0 : i32
    %c0_i32_0 = arith.constant 0 : i32
    return %arg0, %c0_i32 : i32, i32
  }
  func.func @transform_4(%arg0: i32, %arg1: i32) -> (i32, i32) {
    %c0_i32 = arith.constant 0 : i32
    %c0_i32_0 = arith.constant 0 : i32
    %c0_i32_1 = arith.constant 0 : i32
    return %c0_i32, %c0_i32_0 : i32, i32
  }
  func.func @transform_5(%arg0: i32, %arg1: i32) -> (i32, i32) {
    %c0_i32 = arith.constant 0 : i32
    %c0_i32_0 = arith.constant 0 : i32
    %c0_i32_1 = arith.constant 0 : i32
    return %c0_i32, %c0_i32_0 : i32, i32
  }
  func.func @transform_6(%arg0: i32, %arg1: i32) -> (i32, i32) {
    %c0_i32 = arith.constant 0 : i32
    %c0_i32_0 = arith.constant 0 : i32
    return %arg0, %c0_i32 : i32, i32
  }
}

module attributes {stable_mosaic.version = 11 : i64} {
  func.func @_matmul_bias_kernel(%arg0: i32, %arg1: i32, %arg2: i32, %arg3: memref<16x32xbf16, #tpu.memory_space<vmem>>, %arg4: memref<32x64xbf16, #tpu.memory_space<vmem>>, %arg5: memref<1x64xf32, #tpu.memory_space<vmem>>, %arg6: memref<16x64xbf16, #tpu.memory_space<vmem>>, %arg7: memref<16x64xf32, #tpu.memory_space<vmem>>) attributes {dimension_semantics = [#tpu.dimension_semantics<parallel>, #tpu.dimension_semantics<parallel>, #tpu.dimension_semantics<arbitrary>], iteration_bounds = array<i64: 1, 1, 1>, scalar_prefetch = 0 : i64, scratch_operands = 1 : i64, tpu.core_type = #tpu.core_type<tc>, window_params = [{transform_indices = @transform_0, window_bounds = array<i64: 16, 32>}, {transform_indices = @transform_1, window_bounds = array<i64: 32, 64>}, {transform_indices = @transform_2, window_bounds = array<i64: 1, 64>}, {transform_indices = @transform_3, window_bounds = array<i64: 16, 64>}]} {
    %c0_i32 = arith.constant 0 : i32
    %0 = arith.cmpi eq, %arg2, %c0_i32 : i32
    %1 = arith.extui %0 : i1 to i32
    %c0_i32_0 = arith.constant 0 : i32
    %2 = arith.cmpi ne, %1, %c0_i32_0 : i32
    scf.if %2 {
      %cst_10 = arith.constant 0.000000e+00 : f32
      %12 = vector.broadcast %cst_10 : f32 to vector<16x64xf32>
      %c0_11 = arith.constant 0 : index
      %c0_12 = arith.constant 0 : index
      %13 = vector.load %arg7[%c0_11, %c0_12] : memref<16x64xf32, #tpu.memory_space<vmem>>, vector<16x64xf32>
      tpu.vector_store %arg7[%c0_11, %c0_12], %12 {strides = array<i32>} : memref<16x64xf32, #tpu.memory_space<vmem>>, vector<16x64xf32>,
    } else {
    }
    %c0 = arith.constant 0 : index
    %c0_1 = arith.constant 0 : index
    %3 = vector.load %arg7[%c0, %c0_1] : memref<16x64xf32, #tpu.memory_space<vmem>>, vector<16x64xf32>
    %c0_2 = arith.constant 0 : index
    %c0_3 = arith.constant 0 : index
    %4 = vector.load %arg3[%c0_2, %c0_3] : memref<16x32xbf16, #tpu.memory_space<vmem>>, vector<16x32xbf16>
    %c0_4 = arith.constant 0 : index
    %c0_5 = arith.constant 0 : index
    %5 = vector.load %arg4[%c0_4, %c0_5] : memref<32x64xbf16, #tpu.memory_space<vmem>>, vector<32x64xbf16>
    %cst = arith.constant dense<0.000000e+00> : vector<16x64xf32>
    %6 = tpu.matmul %4, %5, %cst {dimension_numbers = #tpu.dot_dimension_numbers<[1], [0], [0], [1], [0, 0, 1, 1], [], []>} : vector<16x32xbf16>, vector<32x64xbf16>, vector<16x64xf32> -> vector<16x64xf32>
    %7 = arith.addf %3, %6 : vector<16x64xf32>
    %c0_6 = arith.constant 0 : index
    %c0_7 = arith.constant 0 : index
    %8 = vector.load %arg7[%c0_6, %c0_7] : memref<16x64xf32, #tpu.memory_space<vmem>>, vector<16x64xf32>
    tpu.vector_store %arg7[%c0_6, %c0_7], %7 {strides = array<i32>} : memref<16x64xf32, #tpu.memory_space<vmem>>, vector<16x64xf32>,
    %c0_i32_8 = arith.constant 0 : i32
    %9 = arith.cmpi eq, %arg2, %c0_i32_8 : i32
    %10 = arith.extui %9 : i1 to i32
    %c0_i32_9 = arith.constant 0 : i32
    %11 = arith.cmpi ne, %10, %c0_i32_9 : i32
    scf.if %11 {
      %c0_10 = arith.constant 0 : index
      %c0_11 = arith.constant 0 : index
      %12 = vector.load %arg7[%c0_10, %c0_11] : memref<16x64xf32, #tpu.memory_space<vmem>>, vector<16x64xf32>
      %c0_12 = arith.constant 0 : index
      %c0_13 = arith.constant 0 : index
      %13 = vector.load %arg5[%c0_12, %c0_13] : memref<1x64xf32, #tpu.memory_space<vmem>>, vector<1x64xf32>
      %14 = vector.broadcast %13 : vector<1x64xf32> to vector<16x64xf32>
      %15 = arith.addf %12, %14 : vector<16x64xf32>
      %cst_14 = arith.constant 0.000000e+00 : f32
      %16 = vector.broadcast %cst_14 : f32 to vector<16x64xf32>
      %17 = arith.maximumf %15, %16 : vector<16x64xf32>
      %18 = arith.truncf %17 : vector<16x64xf32> to vector<16x64xbf16>
      %c0_15 = arith.constant 0 : index
      %c0_16 = arith.constant 0 : index
      %19 = vector.load %arg6[%c0_15, %c0_16] : memref<16x64xbf16, #tpu.memory_space<vmem>>, vector<16x64xbf16>
      tpu.vector_store %arg6[%c0_15, %c0_16], %18 {strides = array<i32>} : memref<16x64xbf16, #tpu.memory_space<vmem>>, vector<16x64xbf16>,
    } else {
    }
    return
  }
  func.func @transform_0(%arg0: i32, %arg1: i32, %arg2: i32) -> (i32, i32) {
    %c0_i32 = arith.constant 0 : i32
    return %arg0, %arg2 : i32, i32
  }
  func.func @transform_1(%arg0: i32, %arg1: i32, %arg2: i32) -> (i32, i32) {
    %c0_i32 = arith.constant 0 : i32
    return %arg2, %arg1 : i32, i32
  }
  func.func @transform_2(%arg0: i32, %arg1: i32, %arg2: i32) -> (i32, i32) {
    %c0_i32 = arith.constant 0 : i32
    %c0_i32_0 = arith.constant 0 : i32
    return %c0_i32, %arg1 : i32, i32
  }
  func.func @transform_3(%arg0: i32, %arg1: i32, %arg2: i32) -> (i32, i32) {
    %c0_i32 = arith.constant 0 : i32
    return %arg0, %arg1 : i32, i32
  }
}

module attributes {stable_mosaic.version = 11 : i64} {
  func.func @_mm_bias_add_ln_kernel(%arg0: i32, %arg1: i32, %arg2: memref<16x64xbf16, #tpu.memory_space<vmem>>, %arg3: memref<64x32xbf16, #tpu.memory_space<vmem>>, %arg4: memref<1x32xf32, #tpu.memory_space<vmem>>, %arg5: memref<16x32xf32, #tpu.memory_space<vmem>>, %arg6: memref<1x32xf32, #tpu.memory_space<vmem>>, %arg7: memref<1x32xf32, #tpu.memory_space<vmem>>, %arg8: memref<16x32xf32, #tpu.memory_space<vmem>>, %arg9: memref<16x32xf32, #tpu.memory_space<vmem>>) attributes {dimension_semantics = [#tpu.dimension_semantics<parallel>, #tpu.dimension_semantics<arbitrary>], iteration_bounds = array<i64: 1, 1>, scalar_prefetch = 0 : i64, scratch_operands = 1 : i64, tpu.core_type = #tpu.core_type<tc>, window_params = [{transform_indices = @transform_0, window_bounds = array<i64: 16, 64>}, {transform_indices = @transform_1, window_bounds = array<i64: 64, 32>}, {pipeline_mode = #tpu.pipeline_mode<synchronous>, transform_indices = @transform_2, window_bounds = array<i64: 1, 32>}, {transform_indices = @transform_3, window_bounds = array<i64: 16, 32>}, {pipeline_mode = #tpu.pipeline_mode<synchronous>, transform_indices = @transform_4, window_bounds = array<i64: 1, 32>}, {pipeline_mode = #tpu.pipeline_mode<synchronous>, transform_indices = @transform_5, window_bounds = array<i64: 1, 32>}, {transform_indices = @transform_6, window_bounds = array<i64: 16, 32>}]} {
    %c0_i32 = arith.constant 0 : i32
    %0 = arith.cmpi eq, %arg1, %c0_i32 : i32
    %1 = arith.extui %0 : i1 to i32
    %c0_i32_0 = arith.constant 0 : i32
    %2 = arith.cmpi ne, %1, %c0_i32_0 : i32
    scf.if %2 {
      %cst_10 = arith.constant 0.000000e+00 : f32
      %12 = vector.broadcast %cst_10 : f32 to vector<16x32xf32>
      %c0_11 = arith.constant 0 : index
      %c0_12 = arith.constant 0 : index
      %13 = vector.load %arg9[%c0_11, %c0_12] : memref<16x32xf32, #tpu.memory_space<vmem>>, vector<16x32xf32>
      tpu.vector_store %arg9[%c0_11, %c0_12], %12 {strides = array<i32>} : memref<16x32xf32, #tpu.memory_space<vmem>>, vector<16x32xf32>,
    } else {
    }
    %c0 = arith.constant 0 : index
    %c0_1 = arith.constant 0 : index
    %3 = vector.load %arg9[%c0, %c0_1] : memref<16x32xf32, #tpu.memory_space<vmem>>, vector<16x32xf32>
    %c0_2 = arith.constant 0 : index
    %c0_3 = arith.constant 0 : index
    %4 = vector.load %arg2[%c0_2, %c0_3] : memref<16x64xbf16, #tpu.memory_space<vmem>>, vector<16x64xbf16>
    %c0_4 = arith.constant 0 : index
    %c0_5 = arith.constant 0 : index
    %5 = vector.load %arg3[%c0_4, %c0_5] : memref<64x32xbf16, #tpu.memory_space<vmem>>, vector<64x32xbf16>
    %cst = arith.constant dense<0.000000e+00> : vector<16x32xf32>
    %6 = tpu.matmul %4, %5, %cst {dimension_numbers = #tpu.dot_dimension_numbers<[1], [0], [0], [1], [0, 0, 1, 1], [], []>} : vector<16x64xbf16>, vector<64x32xbf16>, vector<16x32xf32> -> vector<16x32xf32>
    %7 = arith.addf %3, %6 : vector<16x32xf32>
    %c0_6 = arith.constant 0 : index
    %c0_7 = arith.constant 0 : index
    %8 = vector.load %arg9[%c0_6, %c0_7] : memref<16x32xf32, #tpu.memory_space<vmem>>, vector<16x32xf32>
    tpu.vector_store %arg9[%c0_6, %c0_7], %7 {strides = array<i32>} : memref<16x32xf32, #tpu.memory_space<vmem>>, vector<16x32xf32>,
    %c0_i32_8 = arith.constant 0 : i32
    %9 = arith.cmpi eq, %arg1, %c0_i32_8 : i32
    %10 = arith.extui %9 : i1 to i32
    %c0_i32_9 = arith.constant 0 : i32
    %11 = arith.cmpi ne, %10, %c0_i32_9 : i32
    scf.if %11 {
      %c0_10 = arith.constant 0 : index
      %c0_11 = arith.constant 0 : index
      %12 = vector.load %arg9[%c0_10, %c0_11] : memref<16x32xf32, #tpu.memory_space<vmem>>, vector<16x32xf32>
      %c0_12 = arith.constant 0 : index
      %c0_13 = arith.constant 0 : index
      %13 = vector.load %arg4[%c0_12, %c0_13] : memref<1x32xf32, #tpu.memory_space<vmem>>, vector<1x32xf32>
      %14 = vector.broadcast %13 : vector<1x32xf32> to vector<16x32xf32>
      %15 = arith.addf %12, %14 : vector<16x32xf32>
      %c0_14 = arith.constant 0 : index
      %c0_15 = arith.constant 0 : index
      %16 = vector.load %arg5[%c0_14, %c0_15] : memref<16x32xf32, #tpu.memory_space<vmem>>, vector<16x32xf32>
      %17 = arith.addf %15, %16 : vector<16x32xf32>
      %cst_16 = arith.constant dense<0.000000e+00> : vector<16xf32>
      %18 = vector.multi_reduction <add>, %17, %cst_16 [1] : vector<16x32xf32> to vector<16xf32>
      %19 = vector.shape_cast %18 : vector<16xf32> to vector<16x1xf32>
      %cst_17 = arith.constant 3.200000e+01 : f32
      %20 = vector.broadcast %cst_17 : f32 to vector<16x1xf32>
      %21 = arith.divf %19, %20 : vector<16x1xf32>
      %22 = vector.broadcast %21 : vector<16x1xf32> to vector<16x32xf32>
      %23 = arith.subf %17, %22 : vector<16x32xf32>
      %24 = vector.broadcast %21 : vector<16x1xf32> to vector<16x32xf32>
      %25 = arith.subf %17, %24 : vector<16x32xf32>
      %26 = arith.mulf %23, %25 : vector<16x32xf32>
      %cst_18 = arith.constant dense<0.000000e+00> : vector<16xf32>
      %27 = vector.multi_reduction <add>, %26, %cst_18 [1] : vector<16x32xf32> to vector<16xf32>
      %28 = vector.shape_cast %27 : vector<16xf32> to vector<16x1xf32>
      %cst_19 = arith.constant 3.200000e+01 : f32
      %29 = vector.broadcast %cst_19 : f32 to vector<16x1xf32>
      %30 = arith.divf %28, %29 : vector<16x1xf32>
      %31 = vector.broadcast %21 : vector<16x1xf32> to vector<16x32xf32>
      %32 = arith.subf %17, %31 : vector<16x32xf32>
      %cst_20 = arith.constant 9.99999974E-6 : f32
      %33 = vector.broadcast %cst_20 : f32 to vector<16x1xf32>
      %34 = arith.addf %30, %33 : vector<16x1xf32>
      %35 = math.rsqrt %34 : vector<16x1xf32>
      %36 = vector.broadcast %35 : vector<16x1xf32> to vector<16x32xf32>
      %37 = arith.mulf %32, %36 : vector<16x32xf32>
      %c0_21 = arith.constant 0 : index
      %c0_22 = arith.constant 0 : index
      %38 = vector.load %arg6[%c0_21, %c0_22] : memref<1x32xf32, #tpu.memory_space<vmem>>, vector<1x32xf32>
      %39 = vector.broadcast %38 : vector<1x32xf32> to vector<16x32xf32>
      %40 = arith.mulf %37, %39 : vector<16x32xf32>
      %c0_23 = arith.constant 0 : index
      %c0_24 = arith.constant 0 : index
      %41 = vector.load %arg7[%c0_23, %c0_24] : memref<1x32xf32, #tpu.memory_space<vmem>>, vector<1x32xf32>
      %42 = vector.broadcast %41 : vector<1x32xf32> to vector<16x32xf32>
      %43 = arith.addf %40, %42 : vector<16x32xf32>
      %c0_25 = arith.constant 0 : index
      %c0_26 = arith.constant 0 : index
      %44 = vector.load %arg8[%c0_25, %c0_26] : memref<16x32xf32, #tpu.memory_space<vmem>>, vector<16x32xf32>
      tpu.vector_store %arg8[%c0_25, %c0_26], %43 {strides = array<i32>} : memref<16x32xf32, #tpu.memory_space<vmem>>, vector<16x32xf32>,
    } else {
    }
    return
  }
  func.func @transform_0(%arg0: i32, %arg1: i32) -> (i32, i32) {
    %c0_i32 = arith.constant 0 : i32
    return %arg0, %arg1 : i32, i32
  }
  func.func @transform_1(%arg0: i32, %arg1: i32) -> (i32, i32) {
    %c0_i32 = arith.constant 0 : i32
    %c0_i32_0 = arith.constant 0 : i32
    return %arg1, %c0_i32 : i32, i32
  }
  func.func @transform_2(%arg0: i32, %arg1: i32) -> (i32, i32) {
    %c0_i32 = arith.constant 0 : i32
    %c0_i32_0 = arith.constant 0 : i32
    %c0_i32_1 = arith.constant 0 : i32
    return %c0_i32, %c0_i32_0 : i32, i32
  }
  func.func @transform_3(%arg0: i32, %arg1: i32) -> (i32, i32) {
    %c0_i32 = arith.constant 0 : i32
    %c0_i32_0 = arith.constant 0 : i32
    return %arg0, %c0_i32 : i32, i32
  }
  func.func @transform_4(%arg0: i32, %arg1: i32) -> (i32, i32) {
    %c0_i32 = arith.constant 0 : i32
    %c0_i32_0 = arith.constant 0 : i32
    %c0_i32_1 = arith.constant 0 : i32
    return %c0_i32, %c0_i32_0 : i32, i32
  }
  func.func @transform_5(%arg0: i32, %arg1: i32) -> (i32, i32) {
    %c0_i32 = arith.constant 0 : i32
    %c0_i32_0 = arith.constant 0 : i32
    %c0_i32_1 = arith.constant 0 : i32
    return %c0_i32, %c0_i32_0 : i32, i32
  }
  func.func @transform_6(%arg0: i32, %arg1: i32) -> (i32, i32) {
    %c0_i32 = arith.constant 0 : i32
    %c0_i32_0 = arith.constant 0 : i32
    return %arg0, %c0_i32 : i32, i32
  }
}

module attributes {stable_mosaic.version = 11 : i64} {
  func.func @_matmul_bias_kernel(%arg0: i32, %arg1: i32, %arg2: i32, %arg3: memref<16x32xbf16, #tpu.memory_space<vmem>>, %arg4: memref<32x64xbf16, #tpu.memory_space<vmem>>, %arg5: memref<1x64xf32, #tpu.memory_space<vmem>>, %arg6: memref<16x64xf32, #tpu.memory_space<vmem>>, %arg7: memref<16x64xf32, #tpu.memory_space<vmem>>) attributes {dimension_semantics = [#tpu.dimension_semantics<parallel>, #tpu.dimension_semantics<parallel>, #tpu.dimension_semantics<arbitrary>], iteration_bounds = array<i64: 1, 1, 1>, scalar_prefetch = 0 : i64, scratch_operands = 1 : i64, tpu.core_type = #tpu.core_type<tc>, window_params = [{transform_indices = @transform_0, window_bounds = array<i64: 16, 32>}, {transform_indices = @transform_1, window_bounds = array<i64: 32, 64>}, {transform_indices = @transform_2, window_bounds = array<i64: 1, 64>}, {transform_indices = @transform_3, window_bounds = array<i64: 16, 64>}]} {
    %c0_i32 = arith.constant 0 : i32
    %0 = arith.cmpi eq, %arg2, %c0_i32 : i32
    %1 = arith.extui %0 : i1 to i32
    %c0_i32_0 = arith.constant 0 : i32
    %2 = arith.cmpi ne, %1, %c0_i32_0 : i32
    scf.if %2 {
      %cst_10 = arith.constant 0.000000e+00 : f32
      %12 = vector.broadcast %cst_10 : f32 to vector<16x64xf32>
      %c0_11 = arith.constant 0 : index
      %c0_12 = arith.constant 0 : index
      %13 = vector.load %arg7[%c0_11, %c0_12] : memref<16x64xf32, #tpu.memory_space<vmem>>, vector<16x64xf32>
      tpu.vector_store %arg7[%c0_11, %c0_12], %12 {strides = array<i32>} : memref<16x64xf32, #tpu.memory_space<vmem>>, vector<16x64xf32>,
    } else {
    }
    %c0 = arith.constant 0 : index
    %c0_1 = arith.constant 0 : index
    %3 = vector.load %arg7[%c0, %c0_1] : memref<16x64xf32, #tpu.memory_space<vmem>>, vector<16x64xf32>
    %c0_2 = arith.constant 0 : index
    %c0_3 = arith.constant 0 : index
    %4 = vector.load %arg3[%c0_2, %c0_3] : memref<16x32xbf16, #tpu.memory_space<vmem>>, vector<16x32xbf16>
    %c0_4 = arith.constant 0 : index
    %c0_5 = arith.constant 0 : index
    %5 = vector.load %arg4[%c0_4, %c0_5] : memref<32x64xbf16, #tpu.memory_space<vmem>>, vector<32x64xbf16>
    %cst = arith.constant dense<0.000000e+00> : vector<16x64xf32>
    %6 = tpu.matmul %4, %5, %cst {dimension_numbers = #tpu.dot_dimension_numbers<[1], [0], [0], [1], [0, 0, 1, 1], [], []>} : vector<16x32xbf16>, vector<32x64xbf16>, vector<16x64xf32> -> vector<16x64xf32>
    %7 = arith.addf %3, %6 : vector<16x64xf32>
    %c0_6 = arith.constant 0 : index
    %c0_7 = arith.constant 0 : index
    %8 = vector.load %arg7[%c0_6, %c0_7] : memref<16x64xf32, #tpu.memory_space<vmem>>, vector<16x64xf32>
    tpu.vector_store %arg7[%c0_6, %c0_7], %7 {strides = array<i32>} : memref<16x64xf32, #tpu.memory_space<vmem>>, vector<16x64xf32>,
    %c0_i32_8 = arith.constant 0 : i32
    %9 = arith.cmpi eq, %arg2, %c0_i32_8 : i32
    %10 = arith.extui %9 : i1 to i32
    %c0_i32_9 = arith.constant 0 : i32
    %11 = arith.cmpi ne, %10, %c0_i32_9 : i32
    scf.if %11 {
      %c0_10 = arith.constant 0 : index
      %c0_11 = arith.constant 0 : index
      %12 = vector.load %arg7[%c0_10, %c0_11] : memref<16x64xf32, #tpu.memory_space<vmem>>, vector<16x64xf32>
      %c0_12 = arith.constant 0 : index
      %c0_13 = arith.constant 0 : index
      %13 = vector.load %arg5[%c0_12, %c0_13] : memref<1x64xf32, #tpu.memory_space<vmem>>, vector<1x64xf32>
      %14 = vector.broadcast %13 : vector<1x64xf32> to vector<16x64xf32>
      %15 = arith.addf %12, %14 : vector<16x64xf32>
      %c0_14 = arith.constant 0 : index
      %c0_15 = arith.constant 0 : index
      %16 = vector.load %arg6[%c0_14, %c0_15] : memref<16x64xf32, #tpu.memory_space<vmem>>, vector<16x64xf32>
      tpu.vector_store %arg6[%c0_14, %c0_15], %15 {strides = array<i32>} : memref<16x64xf32, #tpu.memory_space<vmem>>, vector<16x64xf32>,
    } else {
    }
    return
  }
  func.func @transform_0(%arg0: i32, %arg1: i32, %arg2: i32) -> (i32, i32) {
    %c0_i32 = arith.constant 0 : i32
    return %arg0, %arg2 : i32, i32
  }
  func.func @transform_1(%arg0: i32, %arg1: i32, %arg2: i32) -> (i32, i32) {
    %c0_i32 = arith.constant 0 : i32
    return %arg2, %arg1 : i32, i32
  }
  func.func @transform_2(%arg0: i32, %arg1: i32, %arg2: i32) -> (i32, i32) {
    %c0_i32 = arith.constant 0 : i32
    %c0_i32_0 = arith.constant 0 : i32
    return %c0_i32, %arg1 : i32, i32
  }
  func.func @transform_3(%arg0: i32, %arg1: i32, %arg2: i32) -> (i32, i32) {
    %c0_i32 = arith.constant 0 : i32
    return %arg0, %arg1 : i32, i32
  }
}

</mosaic_0001>

<bundles_post_ra>
// kernel: transformer_lm_forward.12
= control target key start
LH: loop header
LB: loop body
LE: loop exit
PB: predicated region body
PF: predicated region fallthrough
CT: control target
= control target key end

     0   :  { %s219_s9 = smov 0   ;;  %s247_s0 = inlined_call_operand.vmem [shape: f32[2,8,32], index: 0, kind: input, shape index: {}]   ;;  %s248_s1 = inlined_call_operand.vmem [shape: f32[8,32], index: 1, kind: input, shape index: {}]   ;;  %s249_s2 = inlined_call_operand.vmem [shape: f32[2,8,32], index: 2, kind: output, shape index: {}]  }
   0x1 LB: > { %s198_s10 = sadd.s32 4294967295, %s221_s9   ;;  %p202_p0 = scmp.ge.s32.totalorder %s221_s9, 1  ;;  %s221_s9 = sphi %s219_s9, %s12_s9  }
   0x2   : > { %p111_p1 = scmp.lt.s32.totalorder %s221_s9, 3 }
   0x4   : > { %p112_p2 = pnand %p202_p0, %p111_p1 }
   0x5   : > { %p131_p3 = scmp.lt.s32.totalorder (!%p112_p2), %s198_s10, 1 }
   0x6   : > { %115 = sbr.rel (%p112_p2) target bundleno = 20 (0x14), region = 28 }
   0xb   : > { %s251_s10 = smov (!%p131_p3, %s198_s10), 1  ;;  %v141_v1 = vld [vmem:[%s248_s1] sm:$0xff]  ;;  %vm143_vm0 = vcmask 261120  }
   0xc   : > { %s203_s11 = sshll.u32 %s251_s10, 3 }
   0xd   : > { %s134_s14 = scalar_lea.vmem %s247_s0, %s203_s11  ;;  %s138_s19 = scalar_lea.vmem %s249_s2, %s203_s11 }
   0xe   : > { %v139_v0 = vld [vmem:[%s134_s14] sm:$0xff] }
   0xf   : > { %v140_v2 = vmul.f32 5.656854, %v139_v0 }
  0x11   : > { %v142_v3 = vadd.f32 %v141_v1, %v140_v2 }
  0x13   : > { %144 = vst.msk [vmem:[%s138_s19] sm:$0xff] %vm143_vm0, %v142_v3 }
  0x14 PF: > { %s12_s9 = sadd.s32 1, %s221_s9  }
  0x15   : > { %p9_p4 = scmp.ge.s32.totalorder %s12_s9, 4  }
  0x17   :  { %11 = sbr.rel (!%p9_p4) target bundleno = 1 (0x1), region = 58 }

// kernel: transformer_lm_forward.13
= control target key start
LH: loop header
LB: loop body
LE: loop exit
PB: predicated region body
PF: predicated region fallthrough
CT: control target
= control target key end

     0   :  { %vm19_vm0 = vcmask 785408   ;;  %v108_v1 = vmov 0.0   ;;  %vm47_vm1 = vcmask 261120   ;;  %vm83_vm2 = vcmask 781312   ;;  %s151_s1 = inlined_call_operand.vmem [shape: bf16[32,96], index: 1, kind: input, shape index: {}]   ;;  %s152_s2 = inlined_call_operand.vmem [shape: f32[1,96], index: 2, kind: input, shape index: {}]   ;;  %s153_s0 = inlined_call_operand.vmem [shape: bf16[16,32], index: 0, kind: input, shape index: {}]   ;;  %s154_s3 = inlined_call_operand.vmem [shape: bf16[16,96], index: 3, kind: output, shape index: {}]  }
   0x1   :  { %v105_v0 = vld [vmem:[%s151_s1 + $0x8] sm:$0xff]  ;;  %20 = vst.msk [vmem:[#allocation2] sm:$0xff] %vm19_vm0, %v108_v1  ;;  %v104_v2 = vld [vmem:[%s151_s1] sm:$0xff] }
   0x2   :  { %21 = vst.msk [vmem:[#allocation2 + $0x8] sm:$0xff] %vm19_vm0, %v108_v1  ;;  %57 = vmatpush.bf16.msra.mxu0 %v105_v0  ;;  %v103_v3 = vld [vmem:[%s153_s0] sm:$0xff] }
   0x3   :  { %v107_v8 = vld [vmem:[%s152_s2] ss:$0 sm:$0xff] }
   0x6   :  { %58 = vmatpush.bf16.msra.mxu0 %v104_v2 }
   0x8   :  { %v22_v4 = vld [vmem:[#allocation2] sm:$0xff] }
   0x9   :  { %102 = vmatmul.msk.bf16.vlgmr.msra.gmra.mxu0 %vm47_vm1, %v103_v3  ;;  %v23_v7 = vld [vmem:[#allocation2 + $0x8] sm:$0xff] }
  0x86   :  { %v60_v5 = vpop.f32.mrf.mxu0 }
  0x87   :  { %v65_v6 = vadd.f32 %v60_v5, %v22_v4 }
  0x89   :  { %68 = vst.msk [vmem:[#allocation2] sm:$0xff] %vm19_vm0, %v65_v6 }
  0x8e   :  { %v62_v9 = vpop.f32.mrf.mxu0 }
  0x8f   :  { %v66_v10 = vadd.f32 %v62_v9, %v23_v7 }
  0x90   :  { %v73_v11 = vld [vmem:[#allocation2] sm:$0xff] }
  0x91   :  { %v79_v12 = vadd.f32 %v107_v8, %v73_v11  ;;  %69 = vst.msk [vmem:[#allocation2 + $0x8] sm:$0xff] %vm19_vm0, %v66_v10 }
  0x93   :  { %v81_v13 = vpack.c.bf16 %v79_v12, %v79_v12 }
  0x95   :  { %84 = vst.msk [vmem:[%s154_s3] sm:$0xf] %vm83_vm2, %v81_v13 }
  0x98   :  { %v74_v14 = vld [vmem:[#allocation2 + $0x8] sm:$0xff] }
  0x99   :  { %v80_v15 = vadd.f32 %v107_v8, %v74_v14 }
  0x9b   :  { %v82_v16 = vpack.c.bf16 %v80_v15, %v80_v15 }
  0x9d   :  { %85 = vst.msk [vmem:[%s154_s3 + $0x4] sm:$0xf] %vm83_vm2, %v82_v16 }

// kernel: transformer_lm_forward.14
= control target key start
LH: loop header
LB: loop body
LE: loop exit
PB: predicated region body
PF: predicated region fallthrough
CT: control target
= control target key end

     0   :  { %s542_s9 = smov 0   ;;  %s610_s0 = inlined_call_operand.vmem [shape: f32[8,8], index: 0, kind: input, shape index: {}]   ;;  %s611_s1 = inlined_call_operand.vmem [shape: bf16[2,8,96], index: 1, kind: input, shape index: {}]   ;;  %s612_s2 = inlined_call_operand.vmem [shape: bf16[2,8,32], index: 2, kind: output, shape index: {}]  }
   0x1 LB: > { %s450_s10 = sadd.s32 4294967295, %s511_s9   ;;  %p454_p0 = scmp.ge.s32.totalorder %s511_s9, 1  ;;  %s511_s9 = sphi %s542_s9, %s12_s9  }
   0x2   : > { %p111_p1 = scmp.lt.s32.totalorder %s511_s9, 3 }
   0x4   : > { %p112_p2 = pnand %p454_p0, %p111_p1 }
   0x5   : > { %p131_p3 = scmp.lt.s32.totalorder (!%p112_p2), %s450_s10, 1  ;;  %s513_s15 = smov (!%p112_p2), 96  }
   0x6   : > { %115 = sbr.rel (%p112_p2) target bundleno = 1201 (0x4b1), region = 28  ;;  %s514_s16 = smov (!%p112_p2), 88  }
   0x7   : > { %s515_s17 = smov (!%p112_p2), 120   ;;  %s516_s18 = smov (!%p112_p2), 64  }
   0x8   : > { %s517_s19 = smov (!%p112_p2), 80   ;;  %s518_s20 = smov (!%p112_p2), 72  }
   0x9   : > { %s519_s21 = smov (!%p112_p2), 112   ;;  %s520_s22 = smov (!%p112_p2), 104  }
   0xa   : > { %s521_s25 = smov (!%p112_p2), 56   ;;  %s522_s26 = smov (!%p112_p2), 40  }
   0xb   : > { %s614_s10 = smov (!%p131_p3, %s450_s10), 1  ;;  %vm147_vm0 = vcmask 64512   ;;  %v140_v9 = vld [vmem:[%s610_s0] sm:$0xff]  ;;  %vm186_vm1 = vcmask 1043456   ;;  %s523_s27 = smov 48   ;;  %vm390_vm2 = vcmask 130048  }
   0xc   : > { %s455_s11 = sshll.u32 %s614_s10, 2  ;;  %s524_s28 = smov 8   ;;  %vm392_vm3 = vcmask 195584   ;;  %vm395_vm4 = vcmask 257024  }
   0xd   : > { %s134_s14 = scalar_lea.vmem %s611_s1, %s455_s11  ;;  %s525_s29 = smov 16  }
   0xe   : > { %v141_v0 = vld [vmem:[%s134_s14] sm:$0xf]  ;;  %s526_s30 = smov 24   ;;  %s138_s5 = scalar_lea.vmem %s612_s2, %s455_s11 }
   0xf   : > { %v143_v1 = vunpack.c.l.b16 %v141_v0 }
  0x11   : > { %v558_v2 = vpack.c.b16 %v143_v1, %v143_v1 }
  0x13   : > { %145 = vrot.lane.b32.xlu0 %v558_v2, %s513_s15  ;;  %205 = vrot.lane.b32.xlu1 %v558_v2, %s514_s16 }
  0x14   : > { %203 = vrot.lane.b32.xlu2 %v558_v2, %s515_s17 }
  0x1c   : > { %181 = vrot.lane.b32.xlu2 %v558_v2, %s516_s18 }
  0x24   : > { %263 = vrot.lane.b32.xlu2 %v558_v2, %s517_s19 }
  0x2c   : > { %321 = vrot.lane.b32.xlu2 %v558_v2, %s518_s20 }
  0x34   : > { %261 = vrot.lane.b32.xlu2 %v558_v2, %s519_s21 }
  0x3c   : > { %319 = vrot.lane.b32.xlu2 %v558_v2, %s520_s22 }
  0x6e   : > { %v204_v7 = vpop.permute.xlu2 %203 }
  0x76   : > { %v182_v14 = vpop.permute.xlu2 %181 }
  0x77   : > { %v188_v19 = vsel %vm186_vm1, %v182_v14, 0 }
  0x78   : > { %197 = vmatpush.bf16.msra.mxu1 %v188_v19 }
  0x7e   : > { %v264_v15 = vpop.permute.xlu2 %263 }
  0x7f   : > { %v269_v17 = vsel %vm147_vm0, %v264_v15, 0 }
  0x80   : > { %278 = vmatpush.bf16.xpose.msrb.mxu1 %v269_v17 }
  0x85   : > { %v146_v3 = vpop.permute.xlu0 %145  ;;  %v206_v5 = vpop.permute.xlu1 %205 }
  0x86   : > { %v152_v4 = vsel %vm147_vm0, %v146_v3, 0  ;;  %v211_v6 = vsel %vm147_vm0, %v206_v5, 0  ;;  %v322_v16 = vpop.permute.xlu2 %321 }
  0x87   : > { %161 = vmatpush.bf16.xpose.msra.mxu0 %v152_v4  ;;  %220 = vmatpush.bf16.xpose.msra.mxu2 %v211_v6  ;;  %v327_v18 = vsel %vm147_vm0, %v322_v16, 0 }
  0x8e   : > { %457 = vmatmul.msk.bf16.vlgmr.msra.gmra.mxu0 %vm147_vm0, %v141_v0  ;;  %459 = vmatmul.msk.bf16.vlgmr.msra.gmra.mxu2 %vm147_vm0, %v204_v7  ;;  %v262_v20 = vpop.permute.xlu2 %261 }
  0x8f   : > { %336 = vmatpush.bf16.xpose.msrb.mxu0 %v327_v18 }
  0x96   : > { %v320_v23 = vpop.permute.xlu2 %319 }
  0x9e   : > { %463 = vmatmul.msk.bf16.vlgmr.msrb.gmra.mxu0 %vm147_vm0, %v320_v23 }
 0x10b   : > { %v163_v8 = vpop.f32.mrf.mxu0 }
 0x10c   : > { %v167_v10 = vmul.f32 0.35355338, %v163_v8 }
 0x10e   : > { %v168_v11 = vadd.f32 %v167_v10, %v140_v9 }
 0x110   : > { %v169_v12 = vsel %vm147_vm0, %v168_v11, -inf }
 0x111   : > { %170 = vmax.xlane.f32.xlu0 %v169_v12  ;;  %v222_v21 = vpop.f32.mrf.mxu2 }
 0x112   : > { %v226_v22 = vmul.f32 0.35355338, %v222_v21 }
 0x113   : > { %v165_v13 = vpop.f32.mrf.mxu0 }
 0x114   : > { %v227_v24 = vadd.f32 %v226_v22, %v140_v9 }
 0x116   : > { %v228_v26 = vsel %vm147_vm0, %v227_v24, -inf }
 0x117   : > { %229 = vmax.xlane.f32.xlu2 %v228_v26 }
 0x119   : > { %v224_v29 = vpop.f32.mrf.mxu2 }
 0x11b   : > { %v338_v32 = vpop.f32.mrf.mxu0 }
 0x11c   : > { %v342_v33 = vmul.f32 0.35355338, %v338_v32 }
 0x11e   : > { %v343_v34 = vadd.f32 %v342_v33, %v140_v9 }
 0x120   : > { %v344_v36 = vsel %vm147_vm0, %v343_v34, -inf }
 0x123   : > { %v340_v37 = vpop.f32.mrf.mxu0 }
 0x184   : > { %v171_v25 = vpop.xlane.xlu0 %170 }
 0x185   : > { %v172_v27 = vsub.f32 %v168_v11, %v171_v25 }
 0x187   : > { %v173_v28 = vmul.f32 1.442695, %v172_v27 }
 0x189   : > { %489 = vpow2.f32 %v173_v28 }
 0x18a   : > { %v230_v43 = vpop.xlane.xlu2 %229 }
 0x18b   : > { %v231_v44 = vsub.f32 %v227_v24, %v230_v43 }
 0x18d   : > { %v232_v45 = vmul.f32 1.442695, %v231_v44 }
 0x18f   : > { %v490_v30 = vpop.eup %489 }
 0x190   : > { %v175_v31 = vsel %vm147_vm0, %v490_v30, 0.0 }
 0x191   : > { %176 = vadd.xlane.f32.xlu1 %v175_v31 }
 0x199   : > { %345 = vmax.xlane.f32.xlu1 %v344_v36 }
 0x1b2   : > { %240 = vrot.lane.b32.xlu1 %v558_v2, %s521_s25 }
 0x1ba   : > { %356 = vrot.lane.b32.xlu1 %v558_v2, %s522_s26 }
 0x204   : > { %v177_v35 = vpop.xlane.xlu1 %176 }
 0x205   : > { %491 = vrcp.f32 %v177_v35 }
 0x206   : > { %493 = vpow2.f32 %v232_v45 }
 0x20b   : > { %v492_v38 = vpop.eup %491 }
 0x20c   : > { %v179_v39 = vmul.f32 %v492_v38, %v490_v30  ;;  %v346_v47 = vpop.xlane.xlu1 %345  ;;  %v494_v54 = vpop.eup %493 }
 0x20d   : > { %v347_v50 = vsub.f32 %v343_v34, %v346_v47  ;;  %v234_v55 = vsel %vm147_vm0, %v494_v54, 0.0 }
 0x20e   : > { %v180_v40 = vpack.c.bf16 %v179_v39, %v179_v39 }
 0x20f   : > { %v348_v52 = vmul.f32 1.442695, %v347_v50 }
 0x210   : > { %458 = vmatmul.msk.bf16.vlgmr.msra.gmra.mxu1 %vm147_vm0, %v180_v40 }
 0x211   : > { %495 = vpow2.f32 %v348_v52 }
 0x217   : > { %v496_v56 = vpop.eup %495 }
 0x218   : > { %v350_v57 = vsel %vm147_vm0, %v496_v56, 0.0 }
 0x220   : > { %461 = vmatmul.msk.bf16.vlgmr.msrb.gmra.mxu1 %vm147_vm0, %v262_v20 }
 0x224   : > { %v241_v58 = vpop.permute.xlu1 %240 }
 0x225   : > { %v246_v59 = vsel %vm186_vm1, %v241_v58, 0 }
 0x226   : > { %255 = vmatpush.bf16.msra.mxu3 %v246_v59 }
 0x22c   : > { %v357_v60 = vpop.permute.xlu1 %356 }
 0x22d   : > { %v362_v61 = vsel %vm186_vm1, %v357_v60, 0 }
 0x22e   : > { %371 = vmatpush.bf16.msrb.mxu2 %v362_v61 }
 0x28d   : > { %v587_v41 = vpop.f32.mrf.mxu1 }
 0x295   : > { %v201_v42 = vpop.f32.mrf.mxu1 }
 0x29d   : > { %v280_v46 = vpop.f32.mrf.mxu1 }
 0x29e   : > { %v284_v48 = vmul.f32 0.35355338, %v280_v46 }
 0x2a0   : > { %v285_v49 = vadd.f32 %v284_v48, %v140_v9 }
 0x2a2   : > { %v286_v51 = vsel %vm147_vm0, %v285_v49, -inf }
 0x2a3   : > { %287 = vmax.xlane.f32.xlu0 %v286_v51 }
 0x2a5   : > { %v282_v53 = vpop.f32.mrf.mxu1 }
 0x2ab   : > { %235 = vadd.xlane.f32.xlu0 %v234_v55 }
 0x2b3   : > { %351 = vadd.xlane.f32.xlu0 %v350_v57 }
 0x316   : > { %v288_v62 = vpop.xlane.xlu0 %287 }
 0x317   : > { %v289_v63 = vsub.f32 %v285_v49, %v288_v62 }
 0x319   : > { %v290_v0 = vmul.f32 1.442695, %v289_v63 }
 0x31b   : > { %497 = vpow2.f32 %v290_v0 }
 0x31e   : > { %v236_v1 = vpop.xlane.xlu0 %235 }
 0x31f   : > { %499 = vrcp.f32 %v236_v1 }
 0x321   : > { %v498_v3 = vpop.eup %497 }
 0x322   : > { %v292_v4 = vsel %vm147_vm0, %v498_v3, 0.0 }
 0x323   : > { %293 = vadd.xlane.f32.xlu0 %v292_v4 }
 0x325   : > { %v500_v5 = vpop.eup %499 }
 0x326   : > { %v352_v6 = vpop.xlane.xlu0 %351  ;;  %v238_v7 = vmul.f32 %v500_v5, %v494_v54 }
 0x327   : > { %501 = vrcp.f32 %v352_v6 }
 0x328   : > { %v239_v8 = vpack.c.bf16 %v238_v7, %v238_v7 }
 0x32a   : > { %460 = vmatmul.msk.bf16.vlgmr.msra.gmra.mxu3 %vm147_vm0, %v239_v8 }
 0x32d   : > { %v502_v9 = vpop.eup %501 }
 0x32e   : > { %v354_v10 = vmul.f32 %v502_v9, %v496_v56 }
 0x330   : > { %v355_v11 = vpack.c.bf16 %v354_v10, %v354_v10 }
 0x332   : > { %464 = vmatmul.msk.bf16.vlgmr.msrb.gmra.mxu2 %vm147_vm0, %v355_v11 }
 0x337   : > { %298 = vrot.lane.b32.xlu0 %v558_v2, %s523_s27 }
 0x396   : > { %v294_v12 = vpop.xlane.xlu0 %293 }
 0x397   : > { %503 = vrcp.f32 %v294_v12 }
 0x39d   : > { %v504_v13 = vpop.eup %503 }
 0x39e   : > { %v296_v14 = vmul.f32 %v504_v13, %v498_v3 }
 0x3a0   : > { %v297_v17 = vpack.c.bf16 %v296_v14, %v296_v14 }
 0x3a9   : > { %v299_v15 = vpop.permute.xlu0 %298 }
 0x3aa   : > { %v304_v16 = vsel %vm186_vm1, %v299_v15, 0 }
 0x3ab   : > { %313 = vmatpush.bf16.msrb.mxu3 %v304_v16 }
 0x3ad   : > { %v257_v18 = vpop.f32.mrf.mxu3 }
 0x3ae   : > { %462 = vmatmul.msk.bf16.vlgmr.msrb.gmra.mxu3 %vm147_vm0, %v297_v17  ;;  %378 = vrot.lane.b32.xlu2 %v257_v18, %s524_s28 }
 0x3b5   : > { %v259_v19 = vpop.f32.mrf.mxu3  ;;  %v373_v20 = vpop.f32.mrf.mxu2 }
 0x3bd   : > { %v375_v21 = vpop.f32.mrf.mxu2 }
 0x408   : > { %v379_v24 = vpop.permute.xlu2 %378 }
 0x409   : > { %v389_v25 = vsel %vm147_vm0, %v587_v41, %v379_v24 }
 0x431   : > { %v315_v22 = vpop.f32.mrf.mxu3 }
 0x432   : > { %382 = vrot.lane.b32.xlu1 %v315_v22, %s525_s29 }
 0x439   : > { %v317_v2 = vpop.f32.mrf.mxu3 }
 0x43a   : > { %386 = vrot.lane.b32.xlu1 %v373_v20, %s526_s30 }
 0x4a4   : > { %v383_v23 = vpop.permute.xlu1 %382 }
 0x4a5   : > { %v391_v26 = vsel %vm390_vm2, %v389_v25, %v383_v23 }
 0x4ac   : > { %v387_v27 = vpop.permute.xlu1 %386 }
 0x4ad   : > { %v393_v28 = vsel %vm392_vm3, %v391_v26, %v387_v27 }
 0x4ae   : > { %v394_v29 = vpack.c.bf16 %v393_v28, %v393_v28 }
 0x4b0   : > { %396 = vst.msk [vmem:[%s138_s5] sm:$0xf] %vm395_vm4, %v394_v29 }
 0x4b1 PF: > { %s12_s9 = sadd.s32 1, %s511_s9  }
 0x4b2   : > { %p9_p4 = scmp.ge.s32.totalorder %s12_s9, 4  }
 0x4b4   :  { %11 = sbr.rel (!%p9_p4) target bundleno = 1 (0x1), region = 58 }

// kernel: transformer_lm_forward.15
= control target key start
LH: loop header
LB: loop body
LE: loop exit
PB: predicated region body
PF: predicated region fallthrough
CT: control target
= control target key end

     0   :  { %vm28_vm0 = vcmask 261120   ;;  %v189_v1 = vmov 0.0   ;;  %v190_v21 = vmov 32.0   ;;  %s267_s1 = inlined_call_operand.vmem [shape: bf16[32,32], index: 1, kind: input, shape index: {}]   ;;  %s268_s0 = inlined_call_operand.vmem [shape: bf16[16,32], index: 0, kind: input, shape index: {}]   ;;  %s269_s2 = inlined_call_operand.vmem [shape: f32[1,32], index: 2, kind: input, shape index: {}]   ;;  %s270_s3 = inlined_call_operand.vmem [shape: f32[16,32], index: 3, kind: input, shape index: {}]   ;;  %s271_s4 = inlined_call_operand.vmem [shape: f32[1,32], index: 4, kind: input, shape index: {}]   ;;  %s272_s5 = inlined_call_operand.vmem [shape: f32[1,32], index: 5, kind: input, shape index: {}]   ;;  %s273_s6 = inlined_call_operand.vmem [shape: f32[16,32], index: 6, kind: output, shape index: {}]  }
   0x1   :  { %v177_v0 = vld [vmem:[%s267_s1 + $0x8] sm:$0xff]  ;;  %29 = vst.msk [vmem:[#allocation2] sm:$0xff] %vm28_vm0, %v189_v1  ;;  %v176_v2 = vld [vmem:[%s267_s1] sm:$0xff]  ;;  %183 = vrcp.f32 %v190_v21 }
   0x2   :  { %30 = vst.msk [vmem:[#allocation2 + $0x8] sm:$0xff] %vm28_vm0, %v189_v1  ;;  %66 = vmatpush.bf16.msra.mxu0 %v177_v0  ;;  %v175_v3 = vld [vmem:[%s268_s0] sm:$0xff]  ;;  %v90_v17 = vld [vmem:[%s270_s3 + $0x8] sm:$0xff] }
   0x3   :  { %v180_v8 = vld [vmem:[%s269_s2] ss:$0 sm:$0xff] }
   0x4   :  { %v89_v12 = vld [vmem:[%s270_s3] sm:$0xff] }
   0x5   :  { %v181_v52 = vld [vmem:[%s271_s4] ss:$0 sm:$0xff] }
   0x6   :  { %67 = vmatpush.bf16.msra.mxu0 %v176_v2  ;;  %v182_v55 = vld [vmem:[%s272_s5] ss:$0 sm:$0xff] }
   0x7   :  { %v184_v22 = vpop.eup %183 }
   0x8   :  { %v31_v4 = vld [vmem:[#allocation2] sm:$0xff]  ;;  %v100_v23 = vmul.f32 32.0, %v184_v22  ;;  %vm104_vm1 = vweird.f32 %v184_v22 }
   0x9   :  { %174 = vmatmul.msk.bf16.vlgmr.msra.gmra.mxu0 %vm28_vm0, %v175_v3  ;;  %v32_v7 = vld [vmem:[#allocation2 + $0x8] sm:$0xff] }
   0xa   :  { %v101_v24 = vsub.f32 1.0, %v100_v23 }
   0xc   :  { %v102_v25 = vmul.f32 %v184_v22, %v101_v24 }
   0xe   :  { %v103_v26 = vadd.f32 %v184_v22, %v102_v25 }
  0x10   :  { %v105_v27 = vsel %vm104_vm1, %v184_v22, %v103_v26 }
  0x86   :  { %v69_v5 = vpop.f32.mrf.mxu0 }
  0x87   :  { %v74_v6 = vadd.f32 %v69_v5, %v31_v4 }
  0x89   :  { %76 = vst.msk [vmem:[#allocation2] sm:$0xff] %vm28_vm0, %v74_v6 }
  0x8e   :  { %v71_v9 = vpop.f32.mrf.mxu0 }
  0x8f   :  { %v75_v10 = vadd.f32 %v71_v9, %v32_v7 }
  0x90   :  { %v81_v11 = vld [vmem:[#allocation2] sm:$0xff] }
  0x91   :  { %77 = vst.msk [vmem:[#allocation2 + $0x8] sm:$0xff] %vm28_vm0, %v75_v10  ;;  %v87_v13 = vadd.f32 %v180_v8, %v81_v11 }
  0x93   :  { %v91_v14 = vadd.f32 %v89_v12, %v87_v13 }
  0x95   :  { %v93_v15 = vsel %vm28_vm0, %v91_v14, 0.0 }
  0x96   :  { %94 = vadd.xlane.f32.xlu0 %v93_v15 }
  0x98   :  { %v82_v16 = vld [vmem:[#allocation2 + $0x8] sm:$0xff] }
  0x99   :  { %v88_v18 = vadd.f32 %v180_v8, %v82_v16 }
  0x9b   :  { %v92_v19 = vadd.f32 %v90_v17, %v88_v18 }
  0x9d   :  { %v96_v20 = vsel %vm28_vm0, %v92_v19, 0.0 }
  0x9e   :  { %97 = vadd.xlane.f32.xlu0 %v96_v20 }
 0x109   :  { %v95_v28 = vpop.xlane.xlu0 %94 }
 0x10a   :  { %v106_v29 = vmul.f32 %v105_v27, %v95_v28 }
 0x10c   :  { %v108_v30 = vsub.f32 %v91_v14, %v106_v29 }
 0x10e   :  { %v110_v31 = vmul.f32 %v108_v30, %v108_v30 }
 0x110   :  { %v112_v32 = vsel %vm28_vm0, %v110_v31, 0.0 }
 0x111   :  { %113 = vadd.xlane.f32.xlu1 %v112_v32  ;;  %v98_v33 = vpop.xlane.xlu0 %97 }
 0x112   :  { %v107_v34 = vmul.f32 %v105_v27, %v98_v33 }
 0x114   :  { %v109_v35 = vsub.f32 %v92_v19, %v107_v34 }
 0x116   :  { %v111_v36 = vmul.f32 %v109_v35, %v109_v35 }
 0x118   :  { %v115_v37 = vsel %vm28_vm0, %v111_v36, 0.0 }
 0x119   :  { %116 = vadd.xlane.f32.xlu1 %v115_v37 }
 0x184   :  { %v114_v38 = vpop.xlane.xlu1 %113 }
 0x185   :  { %v118_v39 = vmul.f32 %v114_v38, %v105_v27 }
 0x187   :  { %v120_v40 = vadd.f32 1e-05, %v118_v39 }
 0x189   :  { %185 = vrsqrt.f32 %v120_v40  ;;  %vm128_vm3 = vweird.f32 %v120_v40 }
 0x18c   :  { %v117_v41 = vpop.xlane.xlu1 %116 }
 0x18d   :  { %v119_v42 = vmul.f32 %v117_v41, %v105_v27 }
 0x18f   :  { %v186_v43 = vpop.eup %185  ;;  %v121_v44 = vadd.f32 1e-05, %v119_v42 }
 0x190   :  { %v123_v45 = vmul.f32 %v186_v43, %v120_v40  ;;  %vm129_vm2 = vweird.f32 %v186_v43 }
 0x191   :  { %187 = vrsqrt.f32 %v121_v44  ;;  %vm130_vm4 = vmor %vm128_vm3, %vm129_vm2  ;;  %vm138_vm6 = vweird.f32 %v121_v44 }
 0x192   :  { %v124_v46 = vmul.f32 %v186_v43, %v123_v45 }
 0x194   :  { %v125_v47 = vmul.f32 0.5, %v124_v46 }
 0x196   :  { %v126_v48 = vsub.f32 1.5, %v125_v47 }
 0x197   :  { %v188_v49 = vpop.eup %187 }
 0x198   :  { %v127_v50 = vmul.f32 %v186_v43, %v126_v48  ;;  %v133_v51 = vmul.f32 %v188_v49, %v121_v44  ;;  %vm139_vm5 = vweird.f32 %v188_v49 }
 0x199   :  { %vm140_vm7 = vmor %vm138_vm6, %vm139_vm5 }
 0x19a   :  { %v131_v53 = vsel %vm130_vm4, %v186_v43, %v127_v50  ;;  %v134_v54 = vmul.f32 %v188_v49, %v133_v51 }
 0x19b   :  { %v142_v56 = vmul.f32 %v131_v53, %v108_v30 }
 0x19c   :  { %v135_v57 = vmul.f32 0.5, %v134_v54 }
 0x19d   :  { %v148_v58 = vmul.f32 %v181_v52, %v142_v56 }
 0x19e   :  { %v136_v59 = vsub.f32 1.5, %v135_v57 }
 0x19f   :  { %v154_v60 = vadd.f32 %v182_v55, %v148_v58 }
 0x1a0   :  { %v137_v61 = vmul.f32 %v188_v49, %v136_v59 }
 0x1a1   :  { %156 = vst.msk [vmem:[%s273_s6] sm:$0xff] %vm28_vm0, %v154_v60 }
 0x1a2   :  { %v141_v62 = vsel %vm140_vm7, %v188_v49, %v137_v61 }
 0x1a3   :  { %v143_v63 = vmul.f32 %v141_v62, %v109_v35 }
 0x1a5   :  { %v149_v0 = vmul.f32 %v181_v52, %v143_v63 }
 0x1a7   :  { %v155_v1 = vadd.f32 %v182_v55, %v149_v0 }
 0x1a9   :  { %157 = vst.msk [vmem:[%s273_s6 + $0x8] sm:$0xff] %vm28_vm0, %v155_v1 }

// kernel: transformer_lm_forward.16
= control target key start
LH: loop header
LB: loop body
LE: loop exit
PB: predicated region body
PF: predicated region fallthrough
CT: control target
= control target key end

     0   :  { %vm19_vm0 = vcmask 523264   ;;  %v110_v1 = vmov 0.0   ;;  %vm47_vm1 = vcmask 261120   ;;  %vm85_vm2 = vcmask 519168   ;;  %s153_s1 = inlined_call_operand.vmem [shape: bf16[32,64], index: 1, kind: input, shape index: {}]   ;;  %s154_s2 = inlined_call_operand.vmem [shape: f32[1,64], index: 2, kind: input, shape index: {}]   ;;  %s155_s0 = inlined_call_operand.vmem [shape: bf16[16,32], index: 0, kind: input, shape index: {}]   ;;  %s156_s3 = inlined_call_operand.vmem [shape: bf16[16,64], index: 3, kind: output, shape index: {}]  }
   0x1   :  { %v107_v0 = vld [vmem:[%s153_s1 + $0x8] sm:$0xff]  ;;  %20 = vst.msk [vmem:[#allocation2] sm:$0xff] %vm19_vm0, %v110_v1  ;;  %v106_v2 = vld [vmem:[%s153_s1] sm:$0xff] }
   0x2   :  { %21 = vst.msk [vmem:[#allocation2 + $0x8] sm:$0xff] %vm19_vm0, %v110_v1  ;;  %57 = vmatpush.bf16.msra.mxu0 %v107_v0  ;;  %v105_v3 = vld [vmem:[%s155_s0] sm:$0xff] }
   0x3   :  { %v109_v8 = vld [vmem:[%s154_s2] ss:$0 sm:$0xff] }
   0x6   :  { %58 = vmatpush.bf16.msra.mxu0 %v106_v2 }
   0x8   :  { %v22_v4 = vld [vmem:[#allocation2] sm:$0xff] }
   0x9   :  { %104 = vmatmul.msk.bf16.vlgmr.msra.gmra.mxu0 %vm47_vm1, %v105_v3  ;;  %v23_v7 = vld [vmem:[#allocation2 + $0x8] sm:$0xff] }
  0x86   :  { %v60_v5 = vpop.f32.mrf.mxu0 }
  0x87   :  { %v65_v6 = vadd.f32 %v60_v5, %v22_v4 }
  0x89   :  { %68 = vst.msk [vmem:[#allocation2] sm:$0xff] %vm19_vm0, %v65_v6 }
  0x8e   :  { %v62_v9 = vpop.f32.mrf.mxu0 }
  0x8f   :  { %v66_v10 = vadd.f32 %v62_v9, %v23_v7 }
  0x90   :  { %v73_v11 = vld [vmem:[#allocation2] sm:$0xff] }
  0x91   :  { %v79_v12 = vadd.f32 %v109_v8, %v73_v11  ;;  %69 = vst.msk [vmem:[#allocation2 + $0x8] sm:$0xff] %vm19_vm0, %v66_v10 }
  0x93   :  { %v81_v13 = vmax.f32 %v79_v12, 0.0 }
  0x95   :  { %v83_v14 = vpack.c.bf16 %v81_v13, %v81_v13 }
  0x97   :  { %86 = vst.msk [vmem:[%s156_s3] sm:$0xf] %vm85_vm2, %v83_v14 }
  0x98   :  { %v74_v15 = vld [vmem:[#allocation2 + $0x8] sm:$0xff] }
  0x99   :  { %v80_v16 = vadd.f32 %v109_v8, %v74_v15 }
  0x9b   :  { %v82_v17 = vmax.f32 %v80_v16, 0.0 }
  0x9d   :  { %v84_v18 = vpack.c.bf16 %v82_v17, %v82_v17 }
  0x9f   :  { %87 = vst.msk [vmem:[%s156_s3 + $0x4] sm:$0xf] %vm85_vm2, %v84_v18 }

// kernel: transformer_lm_forward.17
= control target key start
LH: loop header
LB: loop body
LE: loop exit
PB: predicated region body
PF: predicated region fallthrough
CT: control target
= control target key end

     0   :  { %vm28_vm0 = vcmask 261120   ;;  %v216_v1 = vmov 0.0   ;;  %vm72_vm1 = vcmask 523264   ;;  %v217_v23 = vmov 32.0   ;;  %s299_s1 = inlined_call_operand.vmem [shape: bf16[64,32], index: 1, kind: input, shape index: {}]   ;;  %s300_s0 = inlined_call_operand.vmem [shape: bf16[16,64], index: 0, kind: input, shape index: {}]   ;;  %s301_s2 = inlined_call_operand.vmem [shape: f32[1,32], index: 2, kind: input, shape index: {}]   ;;  %s302_s3 = inlined_call_operand.vmem [shape: f32[16,32], index: 3, kind: input, shape index: {}]   ;;  %s303_s4 = inlined_call_operand.vmem [shape: f32[1,32], index: 4, kind: input, shape index: {}]   ;;  %s304_s5 = inlined_call_operand.vmem [shape: f32[1,32], index: 5, kind: input, shape index: {}]   ;;  %s305_s6 = inlined_call_operand.vmem [shape: f32[16,32], index: 6, kind: output, shape index: {}]  }
   0x1   :  { %v204_v0 = vld [vmem:[%s299_s1 + $0x18] sm:$0xff]  ;;  %29 = vst.msk [vmem:[#allocation2] sm:$0xff] %vm28_vm0, %v216_v1  ;;  %v203_v2 = vld [vmem:[%s299_s1 + $0x10] sm:$0xff]  ;;  %v202_v3 = vld [vmem:[%s299_s1 + $0x8] sm:$0xff]  ;;  %210 = vrcp.f32 %v217_v23 }
   0x2   :  { %30 = vst.msk [vmem:[#allocation2 + $0x8] sm:$0xff] %vm28_vm0, %v216_v1  ;;  %80 = vmatpush.bf16.msra.mxu0 %v204_v0  ;;  %v201_v4 = vld [vmem:[%s299_s1] sm:$0xff]  ;;  %v107_v19 = vld [vmem:[%s302_s3 + $0x8] sm:$0xff] }
   0x3   :  { %v200_v5 = vld [vmem:[%s300_s0] sm:$0xff] }
   0x4   :  { %v207_v10 = vld [vmem:[%s301_s2] ss:$0 sm:$0xff] }
   0x5   :  { %v106_v14 = vld [vmem:[%s302_s3] sm:$0xff] }
   0x6   :  { %81 = vmatpush.bf16.msra.mxu0 %v203_v2  ;;  %v208_v54 = vld [vmem:[%s303_s4] ss:$0 sm:$0xff] }
   0x7   :  { %v211_v24 = vpop.eup %210  ;;  %v209_v57 = vld [vmem:[%s304_s5] ss:$0 sm:$0xff] }
   0x8   :  { %v31_v6 = vld [vmem:[#allocation2] sm:$0xff]  ;;  %v117_v25 = vmul.f32 32.0, %v211_v24  ;;  %vm121_vm2 = vweird.f32 %v211_v24 }
   0x9   :  { %v32_v9 = vld [vmem:[#allocation2 + $0x8] sm:$0xff] }
   0xa   :  { %82 = vmatpush.bf16.msra.mxu0 %v202_v3  ;;  %v118_v26 = vsub.f32 1.0, %v117_v25 }
   0xc   :  { %v119_v27 = vmul.f32 %v211_v24, %v118_v26 }
   0xe   :  { %83 = vmatpush.bf16.msra.mxu0 %v201_v4  ;;  %v120_v28 = vadd.f32 %v211_v24, %v119_v27 }
  0x10   :  { %v122_v29 = vsel %vm121_vm2, %v211_v24, %v120_v28 }
  0x11   :  { %199 = vmatmul.msk.bf16.vlgmr.msra.gmra.mxu0 %vm72_vm1, %v200_v5 }
  0x8e   :  { %v85_v7 = vpop.f32.mrf.mxu0 }
  0x8f   :  { %v90_v8 = vadd.f32 %v85_v7, %v31_v6 }
  0x91   :  { %93 = vst.msk [vmem:[#allocation2] sm:$0xff] %vm28_vm0, %v90_v8 }
  0x96   :  { %v87_v11 = vpop.f32.mrf.mxu0 }
  0x97   :  { %v91_v12 = vadd.f32 %v87_v11, %v32_v9 }
  0x98   :  { %v98_v13 = vld [vmem:[#allocation2] sm:$0xff] }
  0x99   :  { %94 = vst.msk [vmem:[#allocation2 + $0x8] sm:$0xff] %vm28_vm0, %v91_v12  ;;  %v104_v15 = vadd.f32 %v207_v10, %v98_v13 }
  0x9b   :  { %v108_v16 = vadd.f32 %v106_v14, %v104_v15 }
  0x9d   :  { %v110_v17 = vsel %vm28_vm0, %v108_v16, 0.0 }
  0x9e   :  { %111 = vadd.xlane.f32.xlu0 %v110_v17 }
  0xa0   :  { %v99_v18 = vld [vmem:[#allocation2 + $0x8] sm:$0xff] }
  0xa1   :  { %v105_v20 = vadd.f32 %v207_v10, %v99_v18 }
  0xa3   :  { %v109_v21 = vadd.f32 %v107_v19, %v105_v20 }
  0xa5   :  { %v113_v22 = vsel %vm28_vm0, %v109_v21, 0.0 }
  0xa6   :  { %114 = vadd.xlane.f32.xlu0 %v113_v22 }
 0x111   :  { %v112_v30 = vpop.xlane.xlu0 %111 }
 0x112   :  { %v123_v31 = vmul.f32 %v122_v29, %v112_v30 }
 0x114   :  { %v125_v32 = vsub.f32 %v108_v16, %v123_v31 }
 0x116   :  { %v127_v33 = vmul.f32 %v125_v32, %v125_v32 }
 0x118   :  { %v129_v34 = vsel %vm28_vm0, %v127_v33, 0.0 }
 0x119   :  { %130 = vadd.xlane.f32.xlu1 %v129_v34  ;;  %v115_v35 = vpop.xlane.xlu0 %114 }
 0x11a   :  { %v124_v36 = vmul.f32 %v122_v29, %v115_v35 }
 0x11c   :  { %v126_v37 = vsub.f32 %v109_v21, %v124_v36 }
 0x11e   :  { %v128_v38 = vmul.f32 %v126_v37, %v126_v37 }
 0x120   :  { %v132_v39 = vsel %vm28_vm0, %v128_v38, 0.0 }
 0x121   :  { %133 = vadd.xlane.f32.xlu1 %v132_v39 }
 0x18c   :  { %v131_v40 = vpop.xlane.xlu1 %130 }
 0x18d   :  { %v135_v41 = vmul.f32 %v131_v40, %v122_v29 }
 0x18f   :  { %v137_v42 = vadd.f32 1e-05, %v135_v41 }
 0x191   :  { %212 = vrsqrt.f32 %v137_v42  ;;  %vm145_vm4 = vweird.f32 %v137_v42 }
 0x194   :  { %v134_v43 = vpop.xlane.xlu1 %133 }
 0x195   :  { %v136_v44 = vmul.f32 %v134_v43, %v122_v29 }
 0x197   :  { %v213_v45 = vpop.eup %212  ;;  %v138_v46 = vadd.f32 1e-05, %v136_v44 }
 0x198   :  { %v140_v47 = vmul.f32 %v213_v45, %v137_v42  ;;  %vm146_vm3 = vweird.f32 %v213_v45 }
 0x199   :  { %214 = vrsqrt.f32 %v138_v46  ;;  %vm147_vm5 = vmor %vm145_vm4, %vm146_vm3  ;;  %vm155_vm7 = vweird.f32 %v138_v46 }
 0x19a   :  { %v141_v48 = vmul.f32 %v213_v45, %v140_v47 }
 0x19c   :  { %v142_v49 = vmul.f32 0.5, %v141_v48 }
 0x19e   :  { %v143_v50 = vsub.f32 1.5, %v142_v49 }
 0x19f   :  { %v215_v51 = vpop.eup %214 }
 0x1a0   :  { %v144_v52 = vmul.f32 %v213_v45, %v143_v50  ;;  %v150_v53 = vmul.f32 %v215_v51, %v138_v46  ;;  %vm156_vm6 = vweird.f32 %v215_v51 }
 0x1a1   :  { %vm157_vm8 = vmor %vm155_vm7, %vm156_vm6 }
 0x1a2   :  { %v148_v55 = vsel %vm147_vm5, %v213_v45, %v144_v52  ;;  %v151_v56 = vmul.f32 %v215_v51, %v150_v53 }
 0x1a3   :  { %v159_v58 = vmul.f32 %v148_v55, %v125_v32 }
 0x1a4   :  { %v152_v59 = vmul.f32 0.5, %v151_v56 }
 0x1a5   :  { %v165_v60 = vmul.f32 %v208_v54, %v159_v58 }
 0x1a6   :  { %v153_v61 = vsub.f32 1.5, %v152_v59 }
 0x1a7   :  { %v171_v62 = vadd.f32 %v209_v57, %v165_v60 }
 0x1a8   :  { %v154_v63 = vmul.f32 %v215_v51, %v153_v61 }
 0x1a9   :  { %173 = vst.msk [vmem:[%s305_s6] sm:$0xff] %vm28_vm0, %v171_v62 }
 0x1aa   :  { %v158_v0 = vsel %vm157_vm8, %v215_v51, %v154_v63 }
 0x1ab   :  { %v160_v1 = vmul.f32 %v158_v0, %v126_v37 }
 0x1ad   :  { %v166_v2 = vmul.f32 %v208_v54, %v160_v1 }
 0x1af   :  { %v172_v3 = vadd.f32 %v209_v57, %v166_v2 }
 0x1b1   :  { %174 = vst.msk [vmem:[%s305_s6 + $0x8] sm:$0xff] %vm28_vm0, %v172_v3 }

// kernel: transformer_lm_forward.23
= control target key start
LH: loop header
LB: loop body
LE: loop exit
PB: predicated region body
PF: predicated region fallthrough
CT: control target
= control target key end

     0   :  { %vm19_vm0 = vcmask 523264   ;;  %v105_v1 = vmov 0.0   ;;  %vm47_vm1 = vcmask 261120   ;;  %s150_s1 = inlined_call_operand.vmem [shape: bf16[32,64], index: 1, kind: input, shape index: {}]   ;;  %s151_s2 = inlined_call_operand.vmem [shape: f32[1,64], index: 2, kind: input, shape index: {}]   ;;  %s152_s0 = inlined_call_operand.vmem [shape: bf16[16,32], index: 0, kind: input, shape index: {}]   ;;  %s153_s3 = inlined_call_operand.vmem [shape: f32[16,64], index: 3, kind: output, shape index: {}]  }
   0x1   :  { %v102_v0 = vld [vmem:[%s150_s1 + $0x8] sm:$0xff]  ;;  %20 = vst.msk [vmem:[#allocation2] sm:$0xff] %vm19_vm0, %v105_v1  ;;  %v101_v2 = vld [vmem:[%s150_s1] sm:$0xff] }
   0x2   :  { %21 = vst.msk [vmem:[#allocation2 + $0x8] sm:$0xff] %vm19_vm0, %v105_v1  ;;  %57 = vmatpush.bf16.msra.mxu0 %v102_v0  ;;  %v100_v3 = vld [vmem:[%s152_s0] sm:$0xff] }
   0x3   :  { %v104_v8 = vld [vmem:[%s151_s2] ss:$0 sm:$0xff] }
   0x6   :  { %58 = vmatpush.bf16.msra.mxu0 %v101_v2 }
   0x8   :  { %v22_v4 = vld [vmem:[#allocation2] sm:$0xff] }
   0x9   :  { %99 = vmatmul.msk.bf16.vlgmr.msra.gmra.mxu0 %vm47_vm1, %v100_v3  ;;  %v23_v7 = vld [vmem:[#allocation2 + $0x8] sm:$0xff] }
  0x86   :  { %v60_v5 = vpop.f32.mrf.mxu0 }
  0x87   :  { %v65_v6 = vadd.f32 %v60_v5, %v22_v4 }
  0x89   :  { %68 = vst.msk [vmem:[#allocation2] sm:$0xff] %vm19_vm0, %v65_v6 }
  0x8e   :  { %v62_v9 = vpop.f32.mrf.mxu0 }
  0x8f   :  { %v66_v10 = vadd.f32 %v62_v9, %v23_v7 }
  0x90   :  { %v73_v11 = vld [vmem:[#allocation2] sm:$0xff] }
  0x91   :  { %v79_v12 = vadd.f32 %v104_v8, %v73_v11  ;;  %69 = vst.msk [vmem:[#allocation2 + $0x8] sm:$0xff] %vm19_vm0, %v66_v10 }
  0x93   :  { %81 = vst.msk [vmem:[%s153_s3] sm:$0xff] %vm19_vm0, %v79_v12 }
  0x98   :  { %v74_v13 = vld [vmem:[#allocation2 + $0x8] sm:$0xff] }
  0x99   :  { %v80_v14 = vadd.f32 %v104_v8, %v74_v13 }
  0x9b   :  { %82 = vst.msk [vmem:[%s153_s3 + $0x8] sm:$0xff] %vm19_vm0, %v80_v14 }

</bundles_post_ra>
